<compile_context>
chip_gen: v5e
topology: v5e:2x2
jax: 0.10.0
libtpu: 0.0.40
codegen_flags: <defaults>
</compile_context>

<pallas_src>
import functools

import jax
import jax.numpy as jnp
from jax.experimental import pallas as pl
from jax.experimental.pallas import tpu as pltpu


# --------------------------- parameter slab layout ---------------------------
def _round8(n):
    return (n + 7) // 8 * 8


def slab_layout(D, Z, A, H_ENC, H_FWD, H_INV):
    """Row/col placement of every (pre-fused) parameter inside one VMEM slab.

    Every sub-array starts at a row offset that is a multiple of 8 and at lane
    0, so static slices are clean prefix reads (no (8,128) boundary crossing).
    """
    entries = [
        ("w_cat", Z, H_FWD + 2 * H_INV),   # [wf1[:Z] | wi1[:Z] | wi1[Z:]]
        ("wfa",   A, H_FWD),               # action rows of wf1
        ("we1",   D, H_ENC),
        ("we2",   H_ENC, Z),
        ("wf2",   H_FWD, Z),
        ("wi2",   H_INV, A),
        ("be1",   1, H_ENC),
        ("be2",   1, Z),
        ("bf1",   1, H_FWD),
        ("bf2",   1, Z),
        ("bi1",   1, H_INV),
        ("bi2",   1, A),
    ]
    layout, row, width = {}, 0, 0
    for name, r, c in entries:
        layout[name] = (row, r, c)
        row += _round8(r)
        width = max(width, c)
    width = (width + 127) // 128 * 128
    return layout, row, width


def pack_params(p, layout, rows, width):
    """Build the single padded f32 parameter slab (done once, host side)."""
    Z = p["we2"].shape[1]
    A = p["wi2"].shape[1]
    parts = {
        "w_cat": jnp.concatenate([p["wf1"][:Z], p["wi1"][:Z], p["wi1"][Z:]], axis=1),
        "wfa": p["wf1"][Z:Z + A],
        "we1": p["we1"], "we2": p["we2"], "wf2": p["wf2"], "wi2": p["wi2"],
        "be1": p["be1"], "be2": p["be2"], "bf1": p["bf1"],
        "bf2": p["bf2"], "bi1": p["bi1"], "bi2": p["bi2"],
    }
    slab = jnp.zeros((rows, width), jnp.float32)
    for name, (r0, r, c) in layout.items():
        slab = slab.at[r0:r0 + r, :c].set(parts[name].astype(jnp.float32))
    return slab


# ------------------------------- Pallas kernel -------------------------------
def _make_kernel(*, A, H_FWD, H_INV, layout):
    def kernel(x_t_ref, x_tp1_ref, a_idx_ref, w_ref, out_ref):
        f32 = jnp.float32
        blk = x_t_ref.shape[0]

        def wslice(name):                       # static, tile-aligned ref slice
            r0, r, c = layout[name]
            return w_ref[r0:r0 + r, 0:c]

        # ---- encoder: ONE pass over the stacked (2*blk, D) block ----
        x_all = jnp.concatenate([x_t_ref[...], x_tp1_ref[...]], axis=0)
        h = jnp.maximum(
            jnp.dot(x_all, wslice("we1"), preferred_element_type=f32)
            + wslice("be1"), 0.0)
        phi_all = jnp.dot(h, wslice("we2"), preferred_element_type=f32) + wslice("be2")
        phi_t, phi_tp1 = phi_all[:blk], phi_all[blk:]

        # ---- fused forward/inverse first layers: one N = H_FWD+2*H_INV dot ----
        t = jnp.dot(phi_all, wslice("w_cat"), preferred_element_type=f32)
        t_t, t_tp1 = t[:blk], t[blk:]

        # action one-hot: BCE target + action-row contribution (tiny K=A matmul)
        a_idx = a_idx_ref[...]                                        # (blk, 1) i32
        col = jax.lax.broadcasted_iota(jnp.int32, (blk, A), 1)
        a_oh = (col == a_idx).astype(f32)                             # (blk, A)
        wfa_rows = jnp.dot(a_oh, wslice("wfa"), preferred_element_type=f32)

        hf = jnp.maximum(t_t[:, :H_FWD] + wfa_rows + wslice("bf1"), 0.0)
        hi = jnp.maximum(t_t[:, H_FWD:H_FWD + H_INV]
                         + t_tp1[:, H_FWD + H_INV:H_FWD + 2 * H_INV]
                         + wslice("bi1"), 0.0)

        # ---- second layers ----
        phi_diff = jnp.dot(hf, wslice("wf2"), preferred_element_type=f32) + wslice("bf2")
        logits = jnp.dot(hi, wslice("wi2"), preferred_element_type=f32) + wslice("bi2")

        # transition loss: MSE(phi_t + phi_diff, phi_tp1).sum(dim=1)
        err = phi_t + phi_diff - phi_tp1
        loss_trans = jnp.sum(err * err, axis=1, keepdims=True)        # (blk, 1)

        # softmax(dim=1) + BCE vs one-hot (PyTorch -100 log clamp)
        m = jnp.max(logits, axis=1, keepdims=True)
        e = jnp.exp(logits - m)
        p_a = e * pl.reciprocal(jnp.sum(e, axis=1, keepdims=True), approx=False)
        logp = jnp.maximum(jnp.log(p_a), -100.0)
        log1mp = jnp.maximum(jnp.log(1.0 - p_a), -100.0)
        bce_row = jnp.sum(-(a_oh * logp + (1.0 - a_oh) * log1mp),
                          axis=1, keepdims=True)                      # (blk, 1)

        # single lane-dense packed output block (unmasked full-width store):
        # lane 0 = per-sample trans loss, lane 1 = per-sample BCE row sum.
        lane = jax.lax.broadcasted_iota(jnp.int32, out_ref.shape, 1)
        out_ref[...] = jnp.where(lane == 0, loss_trans,
                                 jnp.where(lane == 1, bce_row, 0.0))
    return kernel


# --------------------------------- wrapper -----------------------------------
def wm_forward(x_t, a_t, x_tp1, w_slab, *, A, H_FWD, H_INV, layout, blk=128):
    B, D = x_t.shape
    assert B % blk == 0, "batch must be a multiple of the block size"
    n_blocks = B // blk
    out_lanes = 128

    kernel = _make_kernel(A=A, H_FWD=H_FWD, H_INV=H_INV, layout=layout)
    a_idx = a_t.reshape(B, 1).astype(jnp.int32)

    out = pl.pallas_call(
        kernel,
        out_shape=jax.ShapeDtypeStruct((B, out_lanes), jnp.float32),
        grid=(n_blocks,),
        in_specs=[
            pl.BlockSpec((blk, D), lambda i: (i, 0)),       # x_t block
            pl.BlockSpec((blk, D), lambda i: (i, 0)),       # x_tp1 block
            pl.BlockSpec((blk, 1), lambda i: (i, 0)),       # action indices
            pl.BlockSpec(w_slab.shape, lambda i: (0, 0)),   # params: VMEM-resident
        ],
        out_specs=pl.BlockSpec((blk, out_lanes), lambda i: (i, 0)),
        compiler_params=pltpu.CompilerParams(
            dimension_semantics=("parallel",)),             # v7x: use both TCs
    )(x_t, x_tp1, a_idx, w_slab)

    # Final scalar reductions (tiny) happen here because the batch grid axis is
    # parallel; per-sample values are exact, only the cross-block sums move out.
    loss_trans = out[:, 0]
    trans_mean = jnp.mean(loss_trans)
    inv_loss = jnp.sum(out[:, 1]) * (1.0 / (B * A))
    loss = trans_mean + inv_loss
    loss_dict = {"wm_loss": loss, "wm_trans_loss": trans_mean, "wm_inv_loss": inv_loss}
    return loss_trans, loss, loss_dict


# ---------------------------- plain-JAX reference ----------------------------
def wm_forward_ref(x_t, a_t, x_tp1, p):
    def enc(x):
        h = jnp.maximum(x @ p["we1"] + p["be1"], 0.0)
        return h @ p["we2"] + p["be2"]

    phi_t, phi_tp1 = enc(x_t), enc(x_tp1)
    A = p["wi2"].shape[1]
    a_oh = jax.nn.one_hot(a_t.astype(jnp.int32), A, dtype=jnp.float32)
    fwd_in = jnp.concatenate([phi_t, a_oh], axis=1)
    hf = jnp.maximum(fwd_in @ p["wf1"] + p["bf1"], 0.0)
    phi_diff = hf @ p["wf2"] + p["bf2"]
    loss_trans = jnp.sum(((phi_t + phi_diff) - phi_tp1) ** 2, axis=1)
    inv_in = jnp.concatenate([phi_t, phi_tp1], axis=1)
    hi = jnp.maximum(inv_in @ p["wi1"] + p["bi1"], 0.0)
    probs = jax.nn.softmax(hi @ p["wi2"] + p["bi2"], axis=1)
    logp = jnp.maximum(jnp.log(probs), -100.0)
    log1mp = jnp.maximum(jnp.log(1.0 - probs), -100.0)
    inv = jnp.mean(-(a_oh * logp + (1.0 - a_oh) * log1mp))
    return loss_trans, jnp.mean(loss_trans) + inv, jnp.mean(loss_trans), inv


# ------------------------------ params / main --------------------------------
def _linear_init(key, fan_in, fan_out):
    # mimic torch.nn.Linear default init: U(-1/sqrt(fan_in), 1/sqrt(fan_in))
    kw, kb = jax.random.split(key)
    bound = 1.0 / jnp.sqrt(float(fan_in))
    w = jax.random.uniform(kw, (fan_in, fan_out), jnp.float32, -bound, bound)
    b = jax.random.uniform(kb, (1, fan_out), jnp.float32, -bound, bound)
    return w, b


def make_params(key, D, Z, A, H_ENC=64, H_FWD=64, H_INV=64):
    keys = jax.random.split(key, 6)
    p = {}
    p["we1"], p["be1"] = _linear_init(keys[0], D, H_ENC)
    p["we2"], p["be2"] = _linear_init(keys[1], H_ENC, Z)
    p["wf1"], p["bf1"] = _linear_init(keys[2], Z + A, H_FWD)   # concat(phi, onehot)
    p["wf2"], p["bf2"] = _linear_init(keys[3], H_FWD, Z)
    p["wi1"], p["bi1"] = _linear_init(keys[4], 2 * Z, H_INV)   # concat(phi_t, phi_tp1)
    p["wi2"], p["bi2"] = _linear_init(keys[5], H_INV, A)
    return p


if __name__ == "__main__":
    # x_dim=(32,), z_dim=32, a_dim=(4,); batched to fill the MXU / feed both v7x TCs
    B, D, Z, A = 256, 32, 32, 4
    H_ENC = H_FWD = H_INV = 64
    BLK = 128

    key = jax.random.PRNGKey(0)
    k_x, k_xp, k_a, k_p = jax.random.split(key, 4)
    x_t = jax.random.normal(k_x, (B, D), jnp.float32)
    x_tp1 = jax.random.normal(k_xp, (B, D), jnp.float32)
    a_t = jax.random.randint(k_a, (B,), 0, A, jnp.int32)
    params = make_params(k_p, D, Z, A, H_ENC, H_FWD, H_INV)

    # pack all weights/biases into one padded VMEM slab ONCE (host side)
    layout, rows, width = slab_layout(D, Z, A, H_ENC, H_FWD, H_INV)
    w_slab = pack_params(params, layout, rows, width)

    fwd = jax.jit(functools.partial(
        wm_forward, A=A, H_FWD=H_FWD, H_INV=H_INV, layout=layout, blk=BLK))
    loss_trans, loss, loss_dict = fwd(x_t, a_t, x_tp1, w_slab)
    jax.block_until_ready((loss_trans, loss, loss_dict))

    # correctness check against plain-JAX reference
    ref_trans, ref_loss, ref_tmean, ref_inv = wm_forward_ref(x_t, a_t, x_tp1, params)
    assert jnp.allclose(loss_trans, ref_trans, rtol=1e-5, atol=1e-5)
    assert jnp.allclose(loss, ref_loss, rtol=1e-5, atol=1e-5)
    assert jnp.allclose(loss_dict["wm_trans_loss"], ref_tmean, rtol=1e-5, atol=1e-5)
    assert jnp.allclose(loss_dict["wm_inv_loss"], ref_inv, rtol=1e-5, atol=1e-5)

    print("KERNEL_OK")
</pallas_src>

<mosaic_0001>
module attributes {stable_mosaic.version = 11 : i64} {
  func.func @kernel(%arg0: i32, %arg1: memref<128x32xf32, #tpu.memory_space<vmem>>, %arg2: memref<128x32xf32, #tpu.memory_space<vmem>>, %arg3: memref<128x1xi32, #tpu.memory_space<vmem>>, %arg4: memref<312x256xf32, #tpu.memory_space<vmem>>, %arg5: memref<128x128xf32, #tpu.memory_space<vmem>>) attributes {dimension_semantics = [#tpu.dimension_semantics<parallel>], iteration_bounds = array<i64: 2>, scalar_prefetch = 0 : i64, scratch_operands = 0 : i64, tpu.core_type = #tpu.core_type<tc>, window_params = [{transform_indices = @transform_0, window_bounds = array<i64: 128, 32>}, {transform_indices = @transform_1, window_bounds = array<i64: 128, 32>}, {transform_indices = @transform_2, window_bounds = array<i64: 128, 1>}, {pipeline_mode = #tpu.pipeline_mode<synchronous>, transform_indices = @transform_3, window_bounds = array<i64: 312, 256>}, {transform_indices = @transform_4, window_bounds = array<i64: 128, 128>}]} {
    %c0 = arith.constant 0 : index
    %c0_0 = arith.constant 0 : index
    %0 = vector.load %arg1[%c0, %c0_0] : memref<128x32xf32, #tpu.memory_space<vmem>>, vector<128x32xf32>
    %c0_1 = arith.constant 0 : index
    %c0_2 = arith.constant 0 : index
    %1 = vector.load %arg2[%c0_1, %c0_2] : memref<128x32xf32, #tpu.memory_space<vmem>>, vector<128x32xf32>
    %2 = tpu.concatenate %0, %1 in 0 : vector<128x32xf32>, vector<128x32xf32> -> vector<256x32xf32>
    %c40 = arith.constant 40 : index
    %c0_3 = arith.constant 0 : index
    %3 = vector.load %arg4[%c40, %c0_3] : memref<312x256xf32, #tpu.memory_space<vmem>>, vector<32x64xf32>
    %cst = arith.constant dense<0.000000e+00> : vector<256x64xf32>
    %4 = tpu.matmul %2, %3, %cst {dimension_numbers = #tpu.dot_dimension_numbers<[1], [0], [0], [1], [0, 0, 1, 1], [], []>} : vector<256x32xf32>, vector<32x64xf32>, vector<256x64xf32> -> vector<256x64xf32>
    %c264 = arith.constant 264 : index
    %c0_4 = arith.constant 0 : index
    %5 = vector.load %arg4[%c264, %c0_4] : memref<312x256xf32, #tpu.memory_space<vmem>>, vector<1x64xf32>
    %6 = vector.broadcast %5 : vector<1x64xf32> to vector<256x64xf32>
    %7 = arith.addf %4, %6 : vector<256x64xf32>
    %cst_5 = arith.constant 0.000000e+00 : f32
    %8 = vector.broadcast %cst_5 : f32 to vector<256x64xf32>
    %9 = arith.maximumf %7, %8 : vector<256x64xf32>
    %c72 = arith.constant 72 : index
    %c0_6 = arith.constant 0 : index
    %10 = vector.load %arg4[%c72, %c0_6] : memref<312x256xf32, #tpu.memory_space<vmem>>, vector<64x32xf32>
    %cst_7 = arith.constant dense<0.000000e+00> : vector<256x32xf32>
    %11 = tpu.matmul %9, %10, %cst_7 {dimension_numbers = #tpu.dot_dimension_numbers<[1], [0], [0], [1], [0, 0, 1, 1], [], []>} : vector<256x64xf32>, vector<64x32xf32>, vector<256x32xf32> -> vector<256x32xf32>
    %c272 = arith.constant 272 : index
    %c0_8 = arith.constant 0 : index
    %12 = vector.load %arg4[%c272, %c0_8] : memref<312x256xf32, #tpu.memory_space<vmem>>, vector<1x32xf32>
    %13 = vector.broadcast %12 : vector<1x32xf32> to vector<256x32xf32>
    %14 = arith.addf %11, %13 : vector<256x32xf32>
    %15 = vector.extract_strided_slice %14 {offsets = [0, 0], sizes = [128, 32], strides = [1, 1]} : vector<256x32xf32> to vector<128x32xf32>
    %16 = vector.extract_strided_slice %14 {offsets = [128, 0], sizes = [128, 32], strides = [1, 1]} : vector<256x32xf32> to vector<128x32xf32>
    %c0_9 = arith.constant 0 : index
    %c0_10 = arith.constant 0 : index
    %17 = vector.load %arg4[%c0_9, %c0_10] : memref<312x256xf32, #tpu.memory_space<vmem>>, vector<32x192xf32>
    %cst_11 = arith.constant dense<0.000000e+00> : vector<256x192xf32>
    %18 = tpu.matmul %14, %17, %cst_11 {dimension_numbers = #tpu.dot_dimension_numbers<[1], [0], [0], [1], [0, 0, 1, 1], [], []>} : vector<256x32xf32>, vector<32x192xf32>, vector<256x192xf32> -> vector<256x192xf32>
    %19 = vector.extract_strided_slice %18 {offsets = [0, 0], sizes = [128, 192], strides = [1, 1]} : vector<256x192xf32> to vector<128x192xf32>
    %20 = vector.extract_strided_slice %18 {offsets = [128, 0], sizes = [128, 192], strides = [1, 1]} : vector<256x192xf32> to vector<128x192xf32>
    %c0_12 = arith.constant 0 : index
    %c0_13 = arith.constant 0 : index
    %21 = vector.load %arg3[%c0_12, %c0_13] : memref<128x1xi32, #tpu.memory_space<vmem>>, vector<128x1xi32>
    %22 = tpu.iota {dimensions = array<i32: 1>} : vector<128x4xi32>
    %23 = vector.broadcast %21 : vector<128x1xi32> to vector<128x4xi32>
    %24 = arith.cmpi eq, %22, %23 : vector<128x4xi32>
    %25 = arith.extui %24 : vector<128x4xi1> to vector<128x4xi32>
    %26 = arith.sitofp %25 : vector<128x4xi32> to vector<128x4xf32>
    %c32 = arith.constant 32 : index
    %c0_14 = arith.constant 0 : index
    %27 = vector.load %arg4[%c32, %c0_14] : memref<312x256xf32, #tpu.memory_space<vmem>>, vector<4x64xf32>
    %cst_15 = arith.constant dense<0.000000e+00> : vector<128x64xf32>
    %28 = tpu.matmul %26, %27, %cst_15 {dimension_numbers = #tpu.dot_dimension_numbers<[1], [0], [0], [1], [0, 0, 1, 1], [], []>} : vector<128x4xf32>, vector<4x64xf32>, vector<128x64xf32> -> vector<128x64xf32>
    %29 = vector.extract_strided_slice %19 {offsets = [0, 0], sizes = [128, 64], strides = [1, 1]} : vector<128x192xf32> to vector<128x64xf32>
    %30 = arith.addf %29, %28 : vector<128x64xf32>
    %c280 = arith.constant 280 : index
    %c0_16 = arith.constant 0 : index
    %31 = vector.load %arg4[%c280, %c0_16] : memref<312x256xf32, #tpu.memory_space<vmem>>, vector<1x64xf32>
    %32 = vector.broadcast %31 : vector<1x64xf32> to vector<128x64xf32>
    %33 = arith.addf %30, %32 : vector<128x64xf32>
    %cst_17 = arith.constant 0.000000e+00 : f32
    %34 = vector.broadcast %cst_17 : f32 to vector<128x64xf32>
    %35 = arith.maximumf %33, %34 : vector<128x64xf32>
    %36 = vector.extract_strided_slice %19 {offsets = [0, 64], sizes = [128, 64], strides = [1, 1]} : vector<128x192xf32> to vector<128x64xf32>
    %37 = vector.extract_strided_slice %20 {offsets = [0, 128], sizes = [128, 64], strides = [1, 1]} : vector<128x192xf32> to vector<128x64xf32>
    %38 = arith.addf %36, %37 : vector<128x64xf32>
    %c296 = arith.constant 296 : index
    %c0_18 = arith.constant 0 : index
    %39 = vector.load %arg4[%c296, %c0_18] : memref<312x256xf32, #tpu.memory_space<vmem>>, vector<1x64xf32>
    %40 = vector.broadcast %39 : vector<1x64xf32> to vector<128x64xf32>
    %41 = arith.addf %38, %40 : vector<128x64xf32>
    %cst_19 = arith.constant 0.000000e+00 : f32
    %42 = vector.broadcast %cst_19 : f32 to vector<128x64xf32>
    %43 = arith.maximumf %41, %42 : vector<128x64xf32>
    %c136 = arith.constant 136 : index
    %c0_20 = arith.constant 0 : index
    %44 = vector.load %arg4[%c136, %c0_20] : memref<312x256xf32, #tpu.memory_space<vmem>>, vector<64x32xf32>
    %cst_21 = arith.constant dense<0.000000e+00> : vector<128x32xf32>
    %45 = tpu.matmul %35, %44, %cst_21 {dimension_numbers = #tpu.dot_dimension_numbers<[1], [0], [0], [1], [0, 0, 1, 1], [], []>} : vector<128x64xf32>, vector<64x32xf32>, vector<128x32xf32> -> vector<128x32xf32>
    %c288 = arith.constant 288 : index
    %c0_22 = arith.constant 0 : index
    %46 = vector.load %arg4[%c288, %c0_22] : memref<312x256xf32, #tpu.memory_space<vmem>>, vector<1x32xf32>
    %47 = vector.broadcast %46 : vector<1x32xf32> to vector<128x32xf32>
    %48 = arith.addf %45, %47 : vector<128x32xf32>
    %c200 = arith.constant 200 : index
    %c0_23 = arith.constant 0 : index
    %49 = vector.load %arg4[%c200, %c0_23] : memref<312x256xf32, #tpu.memory_space<vmem>>, vector<64x4xf32>
    %cst_24 = arith.constant dense<0.000000e+00> : vector<128x4xf32>
    %50 = tpu.matmul %43, %49, %cst_24 {dimension_numbers = #tpu.dot_dimension_numbers<[1], [0], [0], [1], [0, 0, 1, 1], [], []>} : vector<128x64xf32>, vector<64x4xf32>, vector<128x4xf32> -> vector<128x4xf32>
    %c304 = arith.constant 304 : index
    %c0_25 = arith.constant 0 : index
    %51 = vector.load %arg4[%c304, %c0_25] : memref<312x256xf32, #tpu.memory_space<vmem>>, vector<1x4xf32>
    %52 = vector.broadcast %51 : vector<1x4xf32> to vector<128x4xf32>
    %53 = arith.addf %50, %52 : vector<128x4xf32>
    %54 = arith.addf %15, %48 : vector<128x32xf32>
    %55 = arith.subf %54, %16 : vector<128x32xf32>
    %56 = arith.mulf %55, %55 : vector<128x32xf32>
    %cst_26 = arith.constant dense<0.000000e+00> : vector<128xf32>
    %57 = vector.multi_reduction <add>, %56, %cst_26 [1] : vector<128x32xf32> to vector<128xf32>
    %58 = vector.shape_cast %57 : vector<128xf32> to vector<128x1xf32>
    %cst_27 = arith.constant dense<0xFF800000> : vector<128xf32>
    %59 = vector.multi_reduction <maximumf>, %53, %cst_27 [1] : vector<128x4xf32> to vector<128xf32>
    %60 = vector.shape_cast %59 : vector<128xf32> to vector<128x1xf32>
    %61 = vector.broadcast %60 : vector<128x1xf32> to vector<128x4xf32>
    %62 = arith.subf %53, %61 : vector<128x4xf32>
    %63 = math.exp %62 : vector<128x4xf32>
    %cst_28 = arith.constant dense<0.000000e+00> : vector<128xf32>
    %64 = vector.multi_reduction <add>, %63, %cst_28 [1] : vector<128x4xf32> to vector<128xf32>
    %65 = vector.shape_cast %64 : vector<128xf32> to vector<128x1xf32>
    %66 = tpu.reciprocal %65 : vector<128x1xf32> -> vector<128x1xf32>
    %67 = vector.broadcast %66 : vector<128x1xf32> to vector<128x4xf32>
    %68 = arith.mulf %63, %67 : vector<128x4xf32>
    %69 = math.log %68 : vector<128x4xf32>
    %cst_29 = arith.constant -1.000000e+02 : f32
    %70 = vector.broadcast %cst_29 : f32 to vector<128x4xf32>
    %71 = arith.maximumf %69, %70 : vector<128x4xf32>
    %cst_30 = arith.constant 1.000000e+00 : f32
    %72 = vector.broadcast %cst_30 : f32 to vector<128x4xf32>
    %73 = arith.subf %72, %68 : vector<128x4xf32>
    %74 = math.log %73 : vector<128x4xf32>
    %cst_31 = arith.constant -1.000000e+02 : f32
    %75 = vector.broadcast %cst_31 : f32 to vector<128x4xf32>
    %76 = arith.maximumf %74, %75 : vector<128x4xf32>
    %77 = arith.mulf %26, %71 : vector<128x4xf32>
    %cst_32 = arith.constant 1.000000e+00 : f32
    %78 = vector.broadcast %cst_32 : f32 to vector<128x4xf32>
    %79 = arith.subf %78, %26 : vector<128x4xf32>
    %80 = arith.mulf %79, %76 : vector<128x4xf32>
    %81 = arith.addf %77, %80 : vector<128x4xf32>
    %cst_33 = arith.constant 0.000000e+00 : f32
    %82 = vector.broadcast %cst_33 : f32 to vector<128x4xf32>
    %83 = arith.subf %82, %81 : vector<128x4xf32>
    %cst_34 = arith.constant dense<0.000000e+00> : vector<128xf32>
    %84 = vector.multi_reduction <add>, %83, %cst_34 [1] : vector<128x4xf32> to vector<128xf32>
    %85 = vector.shape_cast %84 : vector<128xf32> to vector<128x1xf32>
    %86 = tpu.iota {dimensions = array<i32: 1>} : vector<128x128xi32>
    %c0_i32 = arith.constant 0 : i32
    %87 = vector.broadcast %c0_i32 : i32 to vector<128x128xi32>
    %88 = arith.cmpi eq, %86, %87 : vector<128x128xi32>
    %c1_i32 = arith.constant 1 : i32
    %89 = vector.broadcast %c1_i32 : i32 to vector<128x128xi32>
    %90 = arith.cmpi eq, %86, %89 : vector<128x128xi32>
    %cst_35 = arith.constant 0.000000e+00 : f32
    %91 = vector.shape_cast %85 : vector<128x1xf32> to vector<128x1xf32>
    %92 = vector.broadcast %91 : vector<128x1xf32> to vector<128x128xf32>
    %93 = vector.broadcast %cst_35 : f32 to vector<128x128xf32>
    %94 = arith.select %90, %92, %93 : vector<128x128xi1>, vector<128x128xf32>
    %95 = vector.shape_cast %58 : vector<128x1xf32> to vector<128x1xf32>
    %96 = vector.broadcast %95 : vector<128x1xf32> to vector<128x128xf32>
    %97 = arith.select %88, %96, %94 : vector<128x128xi1>, vector<128x128xf32>
    %c0_36 = arith.constant 0 : index
    %c0_37 = arith.constant 0 : index
    %98 = vector.load %arg5[%c0_36, %c0_37] : memref<128x128xf32, #tpu.memory_space<vmem>>, vector<128x128xf32>
    tpu.vector_store %arg5[%c0_36, %c0_37], %97 {strides = array<i32>} : memref<128x128xf32, #tpu.memory_space<vmem>>, vector<128x128xf32>,
    return
  }
  func.func @transform_0(%arg0: i32) -> (i32, i32) {
    %c0_i32 = arith.constant 0 : i32
    %c0_i32_0 = arith.constant 0 : i32
    return %arg0, %c0_i32 : i32, i32
  }
  func.func @transform_1(%arg0: i32) -> (i32, i32) {
    %c0_i32 = arith.constant 0 : i32
    %c0_i32_0 = arith.constant 0 : i32
    return %arg0, %c0_i32 : i32, i32
  }
  func.func @transform_2(%arg0: i32) -> (i32, i32) {
    %c0_i32 = arith.constant 0 : i32
    %c0_i32_0 = arith.constant 0 : i32
    return %arg0, %c0_i32 : i32, i32
  }
  func.func @transform_3(%arg0: i32) -> (i32, i32) {
    %c0_i32 = arith.constant 0 : i32
    %c0_i32_0 = arith.constant 0 : i32
    %c0_i32_1 = arith.constant 0 : i32
    return %c0_i32, %c0_i32_0 : i32, i32
  }
  func.func @transform_4(%arg0: i32) -> (i32, i32) {
    %c0_i32 = arith.constant 0 : i32
    %c0_i32_0 = arith.constant 0 : i32
    return %arg0, %c0_i32 : i32, i32
  }
}

</mosaic_0001>

<bundles_post_ra>
// kernel: wm_forward.1
= control target key start
LH: loop header
LB: loop body
LE: loop exit
PB: predicated region body
PF: predicated region fallthrough
CT: control target
= control target key end

     0   :  { %9 = vsyncpa [#allocation3], 0  ;;  %s3045_s15 = smov 0   ;;  %s4693_s0 = inlined_call_operand.vmem [shape: f32[256,32], index: 0, kind: input, shape index: {}]   ;;  %s4694_s1 = inlined_call_operand.vmem [shape: f32[256,32], index: 1, kind: input, shape index: {}]   ;;  %s4695_s2 = inlined_call_operand.vmem [shape: s32[256,1], index: 2, kind: input, shape index: {}]   ;;  %s4696_s3 = inlined_call_operand.hbm [shape: f32[312,256], index: 3, kind: input, shape index: {}]   ;;  %s4697_s4 = inlined_call_operand.vmem [shape: f32[256,128], index: 4, kind: output, shape index: {}]  }
   0x1 LB: > { %s156_s18 = sshll.u32 %s4696_s3, 4  ;;  %s2595_s19 = sadd.s32 4294967295, %s3012_s15   ;;  %s3012_s15 = sphi %s3045_s15, %s15_s15   ;;  %s157_s18 = int_to_ptr.hbm [resolvable:$true] %s156_s18 }
   0x2   : > { %p2597_p0 = scmp.ge.s32.totalorder %s3012_s15, 1  ;;  %p145_p1 = scmp.lt.s32.totalorder %s3012_s15, 3 }
   0x3   : > { %p2825_p2 = scmp.eq.s32.totalorder %s2595_s19, 0  ;;  %s3014_s20 = smov [#allocation2]  }
   0x4   : > { %p146_p3 = pnand %p2597_p0, %p145_p1  ;;  %s158_s21 = sshll.u32 %s3014_s20, 4  ;;  %s159_s21 = int_to_ptr.vmem [resolvable:$true] %s158_s21 }
   0x5   : > { %s3015_s22 = smov 256   ;;  %s3016_s23 = smov 16  }
   0x6   : > { %p2821_p4 = pneg %p146_p3  ;;  %201 = sbr.rel (%p146_p3) target bundleno = 1467 (0x5bb), region = 36 }
   0x8   : > { %p2822_p5 = pnand %p2825_p2, %p2821_p4 }
   0xa   : > { %2824 = dma.hbm_to_vmem [thread:$0]  (!%p2822_p5), %s157_s18, 9984, %s159_s21, [#allocation3], %s3015_s22, %s3015_s22, %s3016_s23  }
   0xb   : > { %3007 = dma.done.wait (%p2825_p2), [#allocation3], 9984  }
   0xc   : > { %3009 = vsyncadd (%p2825_p2), [#allocation3], 4294957312  ;;  %s2602_s24 = sshll.u32 %s2595_s19, 4  ;;  %v297_v0 = vld [vmem:[#allocation2 + $0x80] sm:$0xff]  ;;  %v296_v1 = vld [vmem:[#allocation2 + $0x70] sm:$0xff]  ;;  %vm299_vm0 = vcmask 261120  }
   0xd   : > { %p239_p6 = scmp.lt.s32.totalorder %s2602_s24, 31  ;;  %408 = vmatpush.msra.mxu0 %v297_v0  ;;  %2805 = vmatpush.msra.mxu1 %v297_v0  ;;  %v295_v2 = vld [vmem:[#allocation2 + $0x60] sm:$0xff]  ;;  %v294_v3 = vld [vmem:[#allocation2 + $0x50] sm:$0xff]  ;;  %vm550_vm1 = vcmask 523264   ;;  %vm1222_vm2 = vcmask 1043456   ;;  %s3018_s6 = smov 64  }
   0xe   : > { %v548_v14 = vld [vmem:[#allocation2 + $0x100] sm:$0xff]  ;;  %v547_v15 = vld [vmem:[#allocation2 + $0xf0] sm:$0xff]  ;;  %vm1173_vm3 = vcmask 31744  }
   0xf   : > { %s4844_s24 = smov (!%p239_p6, %s2602_s24), 31  ;;  %409 = vmatpush.msra.mxu0 %v296_v1  ;;  %2806 = vmatpush.msra.mxu1 %v296_v1  ;;  %v546_v18 = vld [vmem:[#allocation2 + $0xe0] sm:$0xff]  ;;  %v545_v19 = vld [vmem:[#allocation2 + $0xd0] sm:$0xff] }
  0x10   : > { %s3056_s25 = sshll.u32 %s4844_s24, 3  ;;  %v544_v22 = vld [vmem:[#allocation2 + $0xc0] sm:$0xff]  ;;  %v543_v23 = vld [vmem:[#allocation2 + $0xb0] sm:$0xff] }
  0x11   : > { %s3062_s28 = scalar_lea.vmem %s4693_s0, %s3056_s25  ;;  %410 = vmatpush.msra.mxu0 %v295_v2  ;;  %2807 = vmatpush.msra.mxu1 %v295_v2  ;;  %s3085_s5 = scalar_lea.vmem %s4694_s1, %s3056_s25  ;;  %v542_v26 = vld [vmem:[#allocation2 + $0xa0] sm:$0xff]  ;;  %v541_v28 = vld [vmem:[#allocation2 + $0x90] sm:$0xff] }
  0x12   : > { %v262_v4 = vld [vmem:[%s3062_s28] sm:$0xff]  ;;  %v263_v5 = vld [vmem:[%s3062_s28 + $0x8] sm:$0xff]  ;;  %v264_v6 = vld [vmem:[%s3062_s28 + $0x10] sm:$0xff]  ;;  %s3487_s9 = scalar_lea.vmem %s4695_s2, %s3056_s25  ;;  %s4600_s12 = scalar_lea.vmem %s4697_s4, %s3056_s25 }
  0x13   : > { %411 = vmatpush.msra.mxu0 %v294_v3  ;;  %2808 = vmatpush.msra.mxu1 %v294_v3  ;;  %v265_v7 = vld [vmem:[%s3062_s28 + $0x18] sm:$0xff]  ;;  %v266_v8 = vld [vmem:[%s3062_s28 + $0x20] sm:$0xff]  ;;  %v267_v9 = vld [vmem:[%s3062_s28 + $0x28] sm:$0xff] }
  0x14   : > { %2610 = vmatmul.msk.f32.vlgmr.msra.gmra.mxu0 %vm299_vm0, %v262_v4  ;;  %v268_v10 = vld [vmem:[%s3062_s28 + $0x30] sm:$0xff]  ;;  %v269_v11 = vld [vmem:[%s3062_s28 + $0x38] sm:$0xff]  ;;  %v270_v12 = vld [vmem:[%s3062_s28 + $0x40] sm:$0xff] }
  0x15   : > { %v290_v13 = vld [vmem:[%s3085_s5 + $0x60] sm:$0xff]  ;;  %655 = vmatpush.msrb.mxu1 %v548_v14  ;;  %v271_v16 = vld [vmem:[%s3062_s28 + $0x48] sm:$0xff]  ;;  %v272_v20 = vld [vmem:[%s3062_s28 + $0x50] sm:$0xff] }
  0x16   : > { %2638 = vmatmul.msk.f32.vlgmr.msra.gmra.mxu1 %vm299_vm0, %v290_v13  ;;  %v291_v17 = vld [vmem:[%s3085_s5 + $0x68] sm:$0xff]  ;;  %v292_v21 = vld [vmem:[%s3085_s5 + $0x70] sm:$0xff]  ;;  %v273_v24 = vld [vmem:[%s3062_s28 + $0x58] sm:$0xff] }
  0x17   : > { %656 = vmatpush.msrb.mxu1 %v547_v15  ;;  %v293_v25 = vld [vmem:[%s3085_s5 + $0x78] sm:$0xff]  ;;  %v274_v27 = vld [vmem:[%s3062_s28 + $0x60] sm:$0xff]  ;;  %v275_v29 = vld [vmem:[%s3062_s28 + $0x68] sm:$0xff] }
  0x18   : > { %v276_v30 = vld [vmem:[%s3062_s28 + $0x70] sm:$0xff]  ;;  %v277_v31 = vld [vmem:[%s3062_s28 + $0x78] sm:$0xff]  ;;  %v278_v34 = vld [vmem:[%s3085_s5] sm:$0xff] }
  0x19   : > { %657 = vmatpush.msrb.mxu1 %v546_v18  ;;  %v3110_v32 = vld [vmem:[#allocation2 + $0x210] ss:$0 sm:$0xff]  ;;  %v279_v38 = vld [vmem:[%s3085_s5 + $0x8] sm:$0xff]  ;;  %v281_v46 = vld [vmem:[%s3085_s5 + $0x18] sm:$0xff] }
  0x1a   : > { %v280_v42 = vld [vmem:[%s3085_s5 + $0x10] sm:$0xff]  ;;  %v282_v50 = vld [vmem:[%s3085_s5 + $0x20] sm:$0xff]  ;;  %v283_v54 = vld [vmem:[%s3085_s5 + $0x28] sm:$0xff] }
  0x1b   : > { %658 = vmatpush.msrb.mxu1 %v545_v19  ;;  %v284_v58 = vld [vmem:[%s3085_s5 + $0x30] sm:$0xff]  ;;  %v285_v62 = vld [vmem:[%s3085_s5 + $0x38] sm:$0xff]  ;;  %v286_v2 = vld [vmem:[%s3085_s5 + $0x40] sm:$0xff] }
  0x1c   : > { %2611 = vmatmul.msk.f32.gmra.mxu0 %vm299_vm0, %v263_v5  ;;  %v289_v14 = vld [vmem:[%s3085_s5 + $0x58] sm:$0xff] }
  0x1d   : > { %659 = vmatpush.msrb.mxu1 %v544_v22 }
  0x1e   : > { %2639 = vmatmul.msk.f32.gmra.mxu1 %vm299_vm0, %v291_v17 }
  0x1f   : > { %660 = vmatpush.msrb.mxu1 %v543_v23 }
  0x21   : > { %661 = vmatpush.msrb.mxu1 %v542_v26 }
  0x23   : > { %662 = vmatpush.msrb.mxu1 %v541_v28 }
  0x24   : > { %2612 = vmatmul.msk.f32.gmra.mxu0 %vm299_vm0, %v264_v6  ;;  %v287_v6 = vld [vmem:[%s3085_s5 + $0x48] sm:$0xff] }
  0x26   : > { %2640 = vmatmul.msk.f32.gmra.mxu1 %vm299_vm0, %v292_v21  ;;  %v766_v21 = vld [vmem:[#allocation2 + $0x30] sm:$0xff] }
  0x27   : > { %876 = vmatpush.msra.mxu1 %v766_v21  ;;  %2809 = vmatpush.msra.mxu2 %v766_v21 }
  0x2c   : > { %2613 = vmatmul.msk.f32.gmra.mxu0 %vm299_vm0, %v265_v7 }
  0x2e   : > { %2641 = vmatmul.msk.f32.gmra.mxu1 %vm299_vm0, %v293_v25 }
  0x34   : > { %2614 = vmatmul.msk.f32.gmra.mxu0 %vm299_vm0, %v266_v8 }
  0x3c   : > { %2615 = vmatmul.msk.f32.gmra.mxu0 %vm299_vm0, %v267_v9 }
  0x44   : > { %2616 = vmatmul.msk.f32.gmra.mxu0 %vm299_vm0, %v268_v10  ;;  %v288_v10 = vld [vmem:[%s3085_s5 + $0x50] sm:$0xff] }
  0x4c   : > { %2617 = vmatmul.msk.f32.gmra.mxu0 %vm299_vm0, %v269_v11 }
  0x54   : > { %2618 = vmatmul.msk.f32.gmra.mxu0 %vm299_vm0, %v270_v12 }
  0x5c   : > { %2619 = vmatmul.msk.f32.gmra.mxu0 %vm299_vm0, %v271_v16 }
  0x64   : > { %2620 = vmatmul.msk.f32.gmra.mxu0 %vm299_vm0, %v272_v20 }
  0x6c   : > { %2621 = vmatmul.msk.f32.gmra.mxu0 %vm299_vm0, %v273_v24 }
  0x74   : > { %2622 = vmatmul.msk.f32.gmra.mxu0 %vm299_vm0, %v274_v27 }
  0x7c   : > { %2623 = vmatmul.msk.f32.gmra.mxu0 %vm299_vm0, %v275_v29 }
  0x84   : > { %2624 = vmatmul.msk.f32.gmra.mxu0 %vm299_vm0, %v276_v30 }
  0x8c   : > { %2625 = vmatmul.msk.f32.gmra.mxu0 %vm299_vm0, %v277_v31 }
  0x91   : > { %v413_v33 = vpop.f32.mrf.mxu0 }
  0x92   : > { %v414_v35 = vadd.f32 %v413_v33, %v3110_v32 }
  0x93   : > { %v3158_v16 = vpop.f32.mrf.mxu1 }
  0x94   : > { %v509_v36 = vmax.f32 %v414_v35, 0.0  ;;  %2626 = vmatmul.msk.f32.gmra.mxu0 %vm299_vm0, %v278_v34  ;;  %v767_v35 = vld [vmem:[#allocation2 + $0x38] sm:$0xff] }
  0x95   : > { %2813 = vmatpush.msra.mxu3 %v767_v35 }
  0x96   : > { %2642 = vmatmul.msk.f32.vlgmr.msrb.gmra.mxu1 %vm550_vm1, %v509_v36  ;;  %v764_v36 = vld [vmem:[#allocation2 + $0x20] sm:$0xff] }
  0x97   : > { %2810 = vmatpush.msra.mxu2 %v764_v36  ;;  %877 = vmatpush.msra.mxu1 %v764_v36 }
  0x99   : > { %v416_v37 = vpop.f32.mrf.mxu0 }
  0x9a   : > { %v417_v39 = vadd.f32 %v416_v37, %v3110_v32  ;;  %v765_v37 = vld [vmem:[#allocation2 + $0x28] sm:$0xff] }
  0x9b   : > { %v3163_v22 = vpop.f32.mrf.mxu1  ;;  %2814 = vmatpush.msra.mxu3 %v765_v37 }
  0x9c   : > { %v510_v40 = vmax.f32 %v417_v39, 0.0  ;;  %2627 = vmatmul.msk.f32.gmra.mxu0 %vm299_vm0, %v279_v38 }
  0x9e   : > { %2643 = vmatmul.msk.f32.gmra.mxu1 %vm550_vm1, %v510_v40  ;;  %v762_v40 = vld [vmem:[#allocation2 + $0x10] sm:$0xff] }
  0x9f   : > { %2811 = vmatpush.msra.mxu2 %v762_v40  ;;  %878 = vmatpush.msra.mxu1 %v762_v40  ;;  %v498_v40 = vadd.f32 %v3158_v16, %v3110_v32 }
  0xa1   : > { %v419_v41 = vpop.f32.mrf.mxu0 }
  0xa2   : > { %v420_v43 = vadd.f32 %v419_v41, %v3110_v32  ;;  %v763_v41 = vld [vmem:[#allocation2 + $0x18] sm:$0xff] }
  0xa3   : > { %v3168_v26 = vpop.f32.mrf.mxu1  ;;  %2815 = vmatpush.msra.mxu3 %v763_v41 }
  0xa4   : > { %v511_v44 = vmax.f32 %v420_v43, 0.0  ;;  %2628 = vmatmul.msk.f32.gmra.mxu0 %vm299_vm0, %v280_v42 }
  0xa6   : > { %2644 = vmatmul.msk.f32.gmra.mxu1 %vm550_vm1, %v511_v44  ;;  %v760_v44 = vld [vmem:[#allocation2] sm:$0xff] }
  0xa7   : > { %2812 = vmatpush.msra.mxu2 %v760_v44  ;;  %879 = vmatpush.msra.mxu1 %v760_v44 }
  0xa9   : > { %v422_v45 = vpop.f32.mrf.mxu0  ;;  %973 = vmatpush.msrb.mxu1 %v767_v35 }
  0xaa   : > { %v423_v47 = vadd.f32 %v422_v45, %v3110_v32  ;;  %v761_v45 = vld [vmem:[#allocation2 + $0x8] sm:$0xff] }
  0xab   : > { %v3172_v31 = vpop.f32.mrf.mxu1  ;;  %2816 = vmatpush.msra.mxu3 %v761_v45  ;;  %974 = vmatpush.msrb.mxu1 %v765_v37 }
  0xac   : > { %v512_v48 = vmax.f32 %v423_v47, 0.0  ;;  %2629 = vmatmul.msk.f32.gmra.mxu0 %vm299_vm0, %v281_v46 }
  0xad   : > { %975 = vmatpush.msrb.mxu1 %v763_v41 }
  0xae   : > { %2645 = vmatmul.msk.f32.gmra.mxu1 %vm550_vm1, %v512_v48 }
  0xaf   : > { %976 = vmatpush.msrb.mxu1 %v761_v45  ;;  %v501_v45 = vadd.f32 %v3163_v22, %v3110_v32 }
  0xb1   : > { %v425_v49 = vpop.f32.mrf.mxu0 }
  0xb2   : > { %v426_v51 = vadd.f32 %v425_v49, %v3110_v32 }
  0xb4   : > { %v513_v52 = vmax.f32 %v426_v51, 0.0  ;;  %2630 = vmatmul.msk.f32.gmra.mxu0 %vm299_vm0, %v282_v50 }
  0xb6   : > { %2646 = vmatmul.msk.f32.gmra.mxu1 %vm550_vm1, %v513_v52 }
  0xb9   : > { %v428_v53 = vpop.f32.mrf.mxu0 }
  0xba   : > { %v429_v55 = vadd.f32 %v428_v53, %v3110_v32 }
  0xbc   : > { %v514_v56 = vmax.f32 %v429_v55, 0.0  ;;  %2631 = vmatmul.msk.f32.gmra.mxu0 %vm299_vm0, %v283_v54 }
  0xbe   : > { %2647 = vmatmul.msk.f32.gmra.mxu1 %vm550_vm1, %v514_v56 }
  0xc1   : > { %v431_v57 = vpop.f32.mrf.mxu0 }
  0xc2   : > { %v432_v59 = vadd.f32 %v431_v57, %v3110_v32 }
  0xc4   : > { %v515_v60 = vmax.f32 %v432_v59, 0.0  ;;  %2632 = vmatmul.msk.f32.gmra.mxu0 %vm299_vm0, %v284_v58 }
  0xc6   : > { %2648 = vmatmul.msk.f32.gmra.mxu1 %vm550_vm1, %v515_v60  ;;  %v3193_v60 = vld [vmem:[#allocation2 + $0x220] ss:$0 sm:$0xff] }
  0xc9   : > { %v434_v61 = vpop.f32.mrf.mxu0 }
  0xca   : > { %v435_v63 = vadd.f32 %v434_v61, %v3110_v32 }
  0xcc   : > { %v516_v0 = vmax.f32 %v435_v63, 0.0  ;;  %2633 = vmatmul.msk.f32.gmra.mxu0 %vm299_vm0, %v285_v62 }
  0xce   : > { %2649 = vmatmul.msk.f32.gmra.mxu1 %vm550_vm1, %v516_v0 }
  0xd1   : > { %v437_v1 = vpop.f32.mrf.mxu0 }
  0xd2   : > { %v438_v3 = vadd.f32 %v437_v1, %v3110_v32 }
  0xd4   : > { %v517_v4 = vmax.f32 %v438_v3, 0.0  ;;  %2634 = vmatmul.msk.f32.gmra.mxu0 %vm299_vm0, %v286_v2 }
  0xd6   : > { %2650 = vmatmul.msk.f32.gmra.mxu1 %vm550_vm1, %v517_v4 }
  0xd9   : > { %v440_v5 = vpop.f32.mrf.mxu0 }
  0xda   : > { %v441_v7 = vadd.f32 %v440_v5, %v3110_v32 }
  0xdc   : > { %v518_v8 = vmax.f32 %v441_v7, 0.0  ;;  %2635 = vmatmul.msk.f32.gmra.mxu0 %vm299_vm0, %v287_v6 }
  0xde   : > { %2651 = vmatmul.msk.f32.gmra.mxu1 %vm550_vm1, %v518_v8 }
  0xe1   : > { %v443_v9 = vpop.f32.mrf.mxu0 }
  0xe2   : > { %v444_v11 = vadd.f32 %v443_v9, %v3110_v32 }
  0xe4   : > { %v519_v12 = vmax.f32 %v444_v11, 0.0  ;;  %2636 = vmatmul.msk.f32.gmra.mxu0 %vm299_vm0, %v288_v10 }
  0xe6   : > { %2652 = vmatmul.msk.f32.gmra.mxu1 %vm550_vm1, %v519_v12 }
  0xe9   : > { %v446_v13 = vpop.f32.mrf.mxu0 }
  0xea   : > { %v447_v15 = vadd.f32 %v446_v13, %v3110_v32 }
  0xec   : > { %v520_v17 = vmax.f32 %v447_v15, 0.0  ;;  %2637 = vmatmul.msk.f32.gmra.mxu0 %vm299_vm0, %v289_v14 }
  0xee   : > { %2653 = vmatmul.msk.f32.gmra.mxu1 %vm550_vm1, %v520_v17 }
  0xf1   : > { %v449_v18 = vpop.f32.mrf.mxu0 }
  0xf2   : > { %v450_v19 = vadd.f32 %v449_v18, %v3110_v32 }
  0xf4   : > { %v521_v20 = vmax.f32 %v450_v19, 0.0 }
  0xf6   : > { %2654 = vmatmul.msk.f32.gmra.mxu1 %vm550_vm1, %v521_v20 }
  0xf9   : > { %v452_v23 = vpop.f32.mrf.mxu0 }
  0xfa   : > { %v453_v24 = vadd.f32 %v452_v23, %v3110_v32 }
  0xfc   : > { %v522_v25 = vmax.f32 %v453_v24, 0.0 }
  0xfe   : > { %2655 = vmatmul.msk.f32.gmra.mxu1 %vm550_vm1, %v522_v25 }
 0x101   : > { %v455_v27 = vpop.f32.mrf.mxu0 }
 0x102   : > { %v456_v28 = vadd.f32 %v455_v27, %v3110_v32 }
 0x104   : > { %v523_v29 = vmax.f32 %v456_v28, 0.0 }
 0x106   : > { %2656 = vmatmul.msk.f32.gmra.mxu1 %vm550_vm1, %v523_v29 }
 0x109   : > { %v458_v30 = vpop.f32.mrf.mxu0 }
 0x10a   : > { %v459_v33 = vadd.f32 %v458_v30, %v3110_v32 }
 0x10c   : > { %v524_v34 = vmax.f32 %v459_v33, 0.0 }
 0x10e   : > { %2657 = vmatmul.msk.f32.gmra.mxu1 %vm550_vm1, %v524_v34 }
 0x111   : > { %v461_v38 = vpop.f32.mrf.mxu0 }
 0x112   : > { %v462_v39 = vadd.f32 %v461_v38, %v3110_v32 }
 0x113   : > { %v3177_v42 = vpop.f32.mrf.mxu1 }
 0x114   : > { %v525_v43 = vmax.f32 %v462_v39, 0.0 }
 0x116   : > { %2658 = vmatmul.msk.f32.gmra.mxu1 %vm550_vm1, %v525_v43  ;;  %v537_v43 = vmax.f32 %v498_v40, 0.0 }
 0x119   : > { %v464_v46 = vpop.f32.mrf.mxu0 }
 0x11a   : > { %v465_v47 = vadd.f32 %v464_v46, %v3110_v32 }
 0x11b   : > { %v3181_v48 = vpop.f32.mrf.mxu1 }
 0x11c   : > { %v526_v49 = vmax.f32 %v465_v47, 0.0  ;;  %v538_v47 = vmax.f32 %v501_v45, 0.0 }
 0x11e   : > { %2659 = vmatmul.msk.f32.gmra.mxu1 %vm550_vm1, %v526_v49  ;;  %v504_v49 = vadd.f32 %v3168_v26, %v3110_v32 }
 0x121   : > { %v467_v50 = vpop.f32.mrf.mxu0 }
 0x122   : > { %v468_v51 = vadd.f32 %v467_v50, %v3110_v32 }
 0x123   : > { %v3185_v52 = vpop.f32.mrf.mxu1 }
 0x124   : > { %v527_v53 = vmax.f32 %v468_v51, 0.0  ;;  %v539_v51 = vmax.f32 %v504_v49, 0.0 }
 0x126   : > { %2660 = vmatmul.msk.f32.gmra.mxu1 %vm550_vm1, %v527_v53  ;;  %v507_v53 = vadd.f32 %v3172_v31, %v3110_v32 }
 0x129   : > { %v470_v54 = vpop.f32.mrf.mxu0 }
 0x12a   : > { %v471_v55 = vadd.f32 %v470_v54, %v3110_v32 }
 0x12b   : > { %v3189_v56 = vpop.f32.mrf.mxu1 }
 0x12c   : > { %v528_v57 = vmax.f32 %v471_v55, 0.0  ;;  %v540_v55 = vmax.f32 %v507_v53, 0.0 }
 0x12e   : > { %2661 = vmatmul.msk.f32.gmra.mxu1 %vm550_vm1, %v528_v57 }
 0x131   : > { %v473_v58 = vpop.f32.mrf.mxu0 }
 0x132   : > { %v474_v59 = vadd.f32 %v473_v58, %v3110_v32  ;;  %v3308_v58 = vadd.f32 %v3177_v42, %v3193_v60 }
 0x133   : > { %v676_v61 = vpop.f32.mrf.mxu1 }
 0x134   : > { %v529_v62 = vmax.f32 %v474_v59, 0.0  ;;  %v3196_v63 = vadd.f32 %v676_v61, %v3193_v60  ;;  %v3321_v59 = vadd.f32 %v3181_v48, %v3193_v60 }
 0x136   : > { %2662 = vmatmul.msk.f32.gmra.mxu1 %vm550_vm1, %v529_v62  ;;  %2678 = vmatmul.msk.f32.vlgmr.msra.gmra.mxu2 %vm299_vm0, %v3196_v63  ;;  %v3334_v62 = vadd.f32 %v3185_v52, %v3193_v60  ;;  %v3347_v52 = vadd.f32 %v3189_v56, %v3193_v60 }
 0x137   : > { %2710 = vmatmul.msk.f32.vlgmr.msra.gmra.mxu3 %vm299_vm0, %v3196_v63 }
 0x139   : > { %v476_v0 = vpop.f32.mrf.mxu0 }
 0x13a   : > { %v477_v1 = vadd.f32 %v476_v0, %v3110_v32  ;;  %v1172_v0 = vld [vmem:[#allocation2 + $0x40] sm:$0xf] }
 0x13b   : > { %v679_v2 = vpop.f32.mrf.mxu1  ;;  %2754 = vmatpush.msk.msrb.mxu0 %vm1222_vm2, %v1172_v0 }
 0x13c   : > { %v530_v3 = vmax.f32 %v477_v1, 0.0  ;;  %v3205_v4 = vadd.f32 %v679_v2, %v3193_v60 }
 0x13e   : > { %2663 = vmatmul.msk.f32.gmra.mxu1 %vm550_vm1, %v530_v3  ;;  %2679 = vmatmul.msk.f32.gmra.mxu2 %vm299_vm0, %v3205_v4 }
 0x13f   : > { %2711 = vmatmul.msk.f32.gmra.mxu3 %vm299_vm0, %v3205_v4 }
 0x141   : > { %v479_v5 = vpop.f32.mrf.mxu0 }
 0x142   : > { %v480_v6 = vadd.f32 %v479_v5, %v3110_v32 }
 0x143   : > { %v682_v7 = vpop.f32.mrf.mxu1 }
 0x144   : > { %v531_v8 = vmax.f32 %v480_v6, 0.0  ;;  %v3214_v9 = vadd.f32 %v682_v7, %v3193_v60 }
 0x146   : > { %2664 = vmatmul.msk.f32.gmra.mxu1 %vm550_vm1, %v531_v8  ;;  %2680 = vmatmul.msk.f32.gmra.mxu2 %vm299_vm0, %v3214_v9 }
 0x147   : > { %2712 = vmatmul.msk.f32.gmra.mxu3 %vm299_vm0, %v3214_v9 }
 0x149   : > { %v482_v10 = vpop.f32.mrf.mxu0 }
 0x14a   : > { %v483_v11 = vadd.f32 %v482_v10, %v3110_v32 }
 0x14b   : > { %v685_v12 = vpop.f32.mrf.mxu1 }
 0x14c   : > { %v532_v13 = vmax.f32 %v483_v11, 0.0  ;;  %v3223_v14 = vadd.f32 %v685_v12, %v3193_v60 }
 0x14e   : > { %2665 = vmatmul.msk.f32.gmra.mxu1 %vm550_vm1, %v532_v13  ;;  %2681 = vmatmul.msk.f32.gmra.mxu2 %vm299_vm0, %v3223_v14 }
 0x14f   : > { %2713 = vmatmul.msk.f32.gmra.mxu3 %vm299_vm0, %v3223_v14 }
 0x151   : > { %v485_v15 = vpop.f32.mrf.mxu0 }
 0x152   : > { %v486_v17 = vadd.f32 %v485_v15, %v3110_v32 }
 0x153   : > { %v688_v18 = vpop.f32.mrf.mxu1 }
 0x154   : > { %v533_v19 = vmax.f32 %v486_v17, 0.0  ;;  %v3232_v20 = vadd.f32 %v688_v18, %v3193_v60 }
 0x156   : > { %2666 = vmatmul.msk.f32.gmra.mxu1 %vm550_vm1, %v533_v19  ;;  %2682 = vmatmul.msk.f32.gmra.mxu2 %vm299_vm0, %v3232_v20 }
 0x157   : > { %2714 = vmatmul.msk.f32.gmra.mxu3 %vm299_vm0, %v3232_v20 }
 0x159   : > { %v488_v21 = vpop.f32.mrf.mxu0 }
 0x15a   : > { %v489_v23 = vadd.f32 %v488_v21, %v3110_v32 }
 0x15b   : > { %v691_v24 = vpop.f32.mrf.mxu1 }
 0x15c   : > { %v534_v25 = vmax.f32 %v489_v23, 0.0  ;;  %v3241_v27 = vadd.f32 %v691_v24, %v3193_v60 }
 0x15e   : > { %2667 = vmatmul.msk.f32.gmra.mxu1 %vm550_vm1, %v534_v25  ;;  %2683 = vmatmul.msk.f32.gmra.mxu2 %vm299_vm0, %v3241_v27 }
 0x15f   : > { %2715 = vmatmul.msk.f32.gmra.mxu3 %vm299_vm0, %v3241_v27 }
 0x161   : > { %v491_v28 = vpop.f32.mrf.mxu0 }
 0x162   : > { %v492_v29 = vadd.f32 %v491_v28, %v3110_v32 }
 0x163   : > { %v694_v30 = vpop.f32.mrf.mxu1 }
 0x164   : > { %v535_v33 = vmax.f32 %v492_v29, 0.0  ;;  %v3250_v34 = vadd.f32 %v694_v30, %v3193_v60 }
 0x166   : > { %2668 = vmatmul.msk.f32.gmra.mxu1 %vm550_vm1, %v535_v33  ;;  %2684 = vmatmul.msk.f32.gmra.mxu2 %vm299_vm0, %v3250_v34 }
 0x167   : > { %2716 = vmatmul.msk.f32.gmra.mxu3 %vm299_vm0, %v3250_v34 }
 0x169   : > { %v494_v35 = vpop.f32.mrf.mxu0 }
 0x16a   : > { %v495_v36 = vadd.f32 %v494_v35, %v3110_v32 }
 0x16b   : > { %v697_v37 = vpop.f32.mrf.mxu1 }
 0x16c   : > { %v536_v38 = vmax.f32 %v495_v36, 0.0  ;;  %v3259_v39 = vadd.f32 %v697_v37, %v3193_v60 }
 0x16e   : > { %2669 = vmatmul.msk.f32.gmra.mxu1 %vm550_vm1, %v536_v38  ;;  %2685 = vmatmul.msk.f32.gmra.mxu2 %vm299_vm0, %v3259_v39 }
 0x16f   : > { %2717 = vmatmul.msk.f32.gmra.mxu3 %vm299_vm0, %v3259_v39 }
 0x173   : > { %v700_v41 = vpop.f32.mrf.mxu1 }
 0x174   : > { %v3269_v44 = vadd.f32 %v700_v41, %v3193_v60 }
 0x176   : > { %2670 = vmatmul.msk.f32.gmra.mxu1 %vm550_vm1, %v537_v43  ;;  %2686 = vmatmul.msk.f32.gmra.mxu2 %vm299_vm0, %v3269_v44 }
 0x177   : > { %2718 = vmatmul.msk.f32.gmra.mxu3 %vm299_vm0, %v3269_v44 }
 0x17b   : > { %v703_v46 = vpop.f32.mrf.mxu1 }
 0x17c   : > { %v3279_v16 = vadd.f32 %v703_v46, %v3193_v60 }
 0x17e   : > { %2671 = vmatmul.msk.f32.gmra.mxu1 %vm550_vm1, %v538_v47  ;;  %2687 = vmatmul.msk.f32.gmra.mxu2 %vm299_vm0, %v3279_v16 }
 0x17f   : > { %2719 = vmatmul.msk.f32.gmra.mxu3 %vm299_vm0, %v3279_v16 }
 0x183   : > { %v706_v50 = vpop.f32.mrf.mxu1 }
 0x184   : > { %v3289_v22 = vadd.f32 %v706_v50, %v3193_v60 }
 0x186   : > { %2672 = vmatmul.msk.f32.gmra.mxu1 %vm550_vm1, %v539_v51  ;;  %2688 = vmatmul.msk.f32.gmra.mxu2 %vm299_vm0, %v3289_v22 }
 0x187   : > { %2720 = vmatmul.msk.f32.gmra.mxu3 %vm299_vm0, %v3289_v22 }
 0x18b   : > { %v709_v54 = vpop.f32.mrf.mxu1 }
 0x18c   : > { %v3299_v26 = vadd.f32 %v709_v54, %v3193_v60 }
 0x18e   : > { %4727 = vst [vmem:[#allocation5_spill] sm:$0xff] %v3299_v26  ;;  %2673 = vmatmul.msk.f32.gmra.mxu1 %vm550_vm1, %v540_v55  ;;  %2689 = vmatmul.msk.f32.gmra.mxu2 %vm299_vm0, %v3299_v26 }
 0x18f   : > { %2721 = vmatmul.msk.f32.gmra.mxu3 %vm299_vm0, %v3299_v26 }
 0x193   : > { %v712_v57 = vpop.f32.mrf.mxu1 }
 0x194   : > { %v3311_v32 = vadd.f32 %v712_v57, %v3193_v60 }
 0x196   : > { %2674 = vmatmul.msk.f32.vlgmr.msra.gmra.mxu1 %vm299_vm0, %v3308_v58  ;;  %2690 = vmatmul.msk.f32.gmra.mxu2 %vm299_vm0, %v3311_v32 }
 0x197   : > { %2722 = vmatmul.msk.f32.gmra.mxu3 %vm299_vm0, %v3311_v32 }
 0x19b   : > { %v715_v31 = vpop.f32.mrf.mxu1 }
 0x19c   : > { %v3324_v42 = vadd.f32 %v715_v31, %v3193_v60 }
 0x19e   : > { %2675 = vmatmul.msk.f32.gmra.mxu1 %vm299_vm0, %v3321_v59  ;;  %2691 = vmatmul.msk.f32.gmra.mxu2 %vm299_vm0, %v3324_v42 }
 0x19f   : > { %2723 = vmatmul.msk.f32.gmra.mxu3 %vm299_vm0, %v3324_v42 }
 0x1a3   : > { %v718_v61 = vpop.f32.mrf.mxu1 }
 0x1a4   : > { %v3337_v48 = vadd.f32 %v718_v61, %v3193_v60 }
 0x1a6   : > { %2676 = vmatmul.msk.f32.gmra.mxu1 %vm299_vm0, %v3334_v62  ;;  %2692 = vmatmul.msk.f32.gmra.mxu2 %vm299_vm0, %v3337_v48 }
 0x1a7   : > { %2724 = vmatmul.msk.f32.gmra.mxu3 %vm299_vm0, %v3337_v48 }
 0x1ab   : > { %v721_v1 = vpop.f32.mrf.mxu1 }
 0x1ac   : > { %v3350_v2 = vadd.f32 %v721_v1, %v3193_v60  ;;  %v3017_v1 = vmov 0  }
 0x1ad   : > { %2841 = vset.pattern.permute.xlu0 %v3017_v1  ;;  %2842 = vset.pattern.permute.xlu2 %v3017_v1 }
 0x1ae   : > { %2677 = vmatmul.msk.f32.gmra.mxu1 %vm299_vm0, %v3347_v52  ;;  %2693 = vmatmul.msk.f32.gmra.mxu2 %vm299_vm0, %v3350_v2 }
 0x1af   : > { %2725 = vmatmul.msk.f32.gmra.mxu3 %vm299_vm0, %v3350_v2  ;;  %2843 = vset.pattern.permute.xlu1 %v3017_v1 }
 0x1b3   : > { %v724_v3 = vpop.f32.mrf.mxu1 }
 0x1b4   : > { %v3359_v5 = vadd.f32 %v724_v3, %v3193_v60 }
 0x1b6   : > { %2694 = vmatmul.msk.f32.gmra.mxu2 %vm299_vm0, %v3359_v5  ;;  %2706 = vmatmul.msk.f32.vlgmr.msrb.gmra.mxu1 %vm299_vm0, %v3308_v58 }
 0x1b7   : > { %2726 = vmatmul.msk.f32.gmra.mxu3 %vm299_vm0, %v3359_v5 }
 0x1b9   : > { %v3367_v56 = vpop.f32.mrf.mxu2 }
 0x1ba   : > { %v986_v6 = vpop.f32.mrf.mxu3 }
 0x1bb   : > { %v727_v7 = vpop.f32.mrf.mxu1 }
 0x1bc   : > { %v3370_v8 = vadd.f32 %v727_v7, %v3193_v60 }
 0x1be   : > { %2695 = vmatmul.msk.f32.gmra.mxu2 %vm299_vm0, %v3370_v8  ;;  %2707 = vmatmul.msk.f32.gmra.mxu1 %vm299_vm0, %v3321_v59 }
 0x1bf   : > { %2727 = vmatmul.msk.f32.gmra.mxu3 %vm299_vm0, %v3370_v8 }
 0x1c1   : > { %v3378_v10 = vpop.f32.mrf.mxu2 }
 0x1c2   : > { %v988_v11 = vpop.f32.mrf.mxu3 }
 0x1c3   : > { %v730_v12 = vpop.f32.mrf.mxu1  ;;  %v1586_v11 = vld [vmem:[#allocation2 + $0x200] sm:$0xff] }
 0x1c4   : > { %v3381_v13 = vadd.f32 %v730_v12, %v3193_v60  ;;  %1676 = vmatpush.msrb.mxu3 %v1586_v11  ;;  %v1061_v11 = vld [vmem:[%s3487_s9 + $0x18] sm:$0xff] }
 0x1c6   : > { %2696 = vmatmul.msk.f32.gmra.mxu2 %vm299_vm0, %v3381_v13  ;;  %2708 = vmatmul.msk.f32.gmra.mxu1 %vm299_vm0, %v3334_v62 }
 0x1c7   : > { %2728 = vmatmul.msk.f32.gmra.mxu3 %vm299_vm0, %v3381_v13 }
 0x1c9   : > { %v3389_v15 = vpop.f32.mrf.mxu2 }
 0x1ca   : > { %v990_v17 = vpop.f32.mrf.mxu3 }
 0x1cb   : > { %v733_v18 = vpop.f32.mrf.mxu1 }
 0x1cc   : > { %v3392_v19 = vadd.f32 %v733_v18, %v3193_v60 }
 0x1ce   : > { %2697 = vmatmul.msk.f32.gmra.mxu2 %vm299_vm0, %v3392_v19  ;;  %2709 = vmatmul.msk.f32.gmra.mxu1 %vm299_vm0, %v3347_v52 }
 0x1cf   : > { %2729 = vmatmul.msk.f32.gmra.mxu3 %vm299_vm0, %v3392_v19 }
 0x1d1   : > { %v3400_v21 = vpop.f32.mrf.mxu2 }
 0x1d2   : > { %v992_v23 = vpop.f32.mrf.mxu3 }
 0x1d3   : > { %v736_v24 = vpop.f32.mrf.mxu1 }
 0x1d4   : > { %v3403_v25 = vadd.f32 %v736_v24, %v3193_v60 }
 0x1d6   : > { %2698 = vmatmul.msk.f32.gmra.mxu2 %vm299_vm0, %v3403_v25 }
 0x1d7   : > { %2730 = vmatmul.msk.f32.gmra.mxu3 %vm299_vm0, %v3403_v25 }
 0x1d9   : > { %v3409_v28 = vpop.f32.mrf.mxu2 }
 0x1da   : > { %v994_v29 = vpop.f32.mrf.mxu3 }
 0x1db   : > { %v739_v30 = vpop.f32.mrf.mxu1 }
 0x1dc   : > { %v3412_v33 = vadd.f32 %v739_v30, %v3193_v60  ;;  %v1420_v30 = vld [vmem:[#allocation2 + $0x250] ss:$0 sm:$0xff] }
 0x1de   : > { %2699 = vmatmul.msk.f32.gmra.mxu2 %vm299_vm0, %v3412_v33 }
 0x1df   : > { %2731 = vmatmul.msk.f32.gmra.mxu3 %vm299_vm0, %v3412_v33 }
 0x1e1   : > { %v3418_v35 = vpop.f32.mrf.mxu2 }
 0x1e2   : > { %v996_v36 = vpop.f32.mrf.mxu3 }
 0x1e3   : > { %v742_v37 = vpop.f32.mrf.mxu1 }
 0x1e4   : > { %v3421_v38 = vadd.f32 %v742_v37, %v3193_v60 }
 0x1e6   : > { %2700 = vmatmul.msk.f32.gmra.mxu2 %vm299_vm0, %v3421_v38 }
 0x1e7   : > { %2732 = vmatmul.msk.f32.gmra.mxu3 %vm299_vm0, %v3421_v38 }
 0x1e9   : > { %v3427_v40 = vpop.f32.mrf.mxu2 }
 0x1ea   : > { %v998_v41 = vpop.f32.mrf.mxu3 }
 0x1eb   : > { %v745_v43 = vpop.f32.mrf.mxu1 }
 0x1ec   : > { %v3430_v45 = vadd.f32 %v745_v43, %v3193_v60  ;;  %v1585_v43 = vld [vmem:[#allocation2 + $0x1f0] sm:$0xff] }
 0x1ed   : > { %1677 = vmatpush.msrb.mxu3 %v1585_v43 }
 0x1ee   : > { %2701 = vmatmul.msk.f32.gmra.mxu2 %vm299_vm0, %v3430_v45 }
 0x1ef   : > { %2733 = vmatmul.msk.f32.gmra.mxu3 %vm299_vm0, %v3430_v45 }
 0x1f1   : > { %v3436_v46 = vpop.f32.mrf.mxu2 }
 0x1f2   : > { %v1000_v47 = vpop.f32.mrf.mxu3 }
 0x1f3   : > { %v748_v49 = vpop.f32.mrf.mxu1  ;;  %v1058_v47 = vld [vmem:[%s3487_s9] sm:$0xff] }
 0x1f4   : > { %v3439_v50 = vadd.f32 %v748_v49, %v3193_v60 }
 0x1f6   : > { %2702 = vmatmul.msk.f32.gmra.mxu2 %vm299_vm0, %v3439_v50 }
 0x1f7   : > { %2734 = vmatmul.msk.f32.gmra.mxu3 %vm299_vm0, %v3439_v50 }
 0x1f9   : > { %v3445_v51 = vpop.f32.mrf.mxu2 }
 0x1fa   : > { %v1002_v53 = vpop.f32.mrf.mxu3 }
 0x1fb   : > { %v751_v54 = vpop.f32.mrf.mxu1 }
 0x1fc   : > { %v3448_v55 = vadd.f32 %v751_v54, %v3193_v60 }
 0x1fe   : > { %2703 = vmatmul.msk.f32.gmra.mxu2 %vm299_vm0, %v3448_v55 }
 0x1ff   : > { %2735 = vmatmul.msk.f32.gmra.mxu3 %vm299_vm0, %v3448_v55 }
 0x201   : > { %v3454_v57 = vpop.f32.mrf.mxu2 }
 0x202   : > { %v1004_v31 = vpop.f32.mrf.mxu3 }
 0x203   : > { %v754_v61 = vpop.f32.mrf.mxu1  ;;  %v1464_v31 = vld [vmem:[#allocation2 + $0x180] sm:$0xff] }
 0x204   : > { %v3457_v0 = vadd.f32 %v754_v61, %v3193_v60  ;;  %1522 = vmatpush.msrb.mxu2 %v1464_v31  ;;  %v1060_v61 = vld [vmem:[%s3487_s9 + $0x10] sm:$0xff] }
 0x206   : > { %2704 = vmatmul.msk.f32.gmra.mxu2 %vm299_vm0, %v3457_v0 }
 0x207   : > { %2736 = vmatmul.msk.f32.gmra.mxu3 %vm299_vm0, %v3457_v0 }
 0x209   : > { %v3463_v3 = vpop.f32.mrf.mxu2 }
 0x20a   : > { %v1006_v6 = vpop.f32.mrf.mxu3 }
 0x20b   : > { %v757_v7 = vpop.f32.mrf.mxu1 }
 0x20c   : > { %v3466_v12 = vadd.f32 %v757_v7, %v3193_v60 }
 0x20e   : > { %4728 = vst [vmem:[#allocation6_spill] sm:$0xff] %v3466_v12  ;;  %2705 = vmatmul.msk.f32.gmra.mxu2 %vm299_vm0, %v3466_v12 }
 0x20f   : > { %2737 = vmatmul.msk.f32.gmra.mxu3 %vm299_vm0, %v3466_v12 }
 0x211   : > { %v3472_v17 = vpop.f32.mrf.mxu2 }
 0x212   : > { %v1008_v18 = vpop.f32.mrf.mxu3 }
 0x213   : > { %v3474_v23 = vpop.f32.mrf.mxu1 }
 0x219   : > { %v929_v24 = vpop.f32.mrf.mxu2 }
 0x21a   : > { %v1010_v29 = vpop.f32.mrf.mxu3 }
 0x21b   : > { %1356 = vrot.lane.b32.xlu0 %v1010_v29, %s3018_s6  ;;  %v3477_v60 = vpop.f32.mrf.mxu1 }
 0x221   : > { %v931_v36 = vpop.f32.mrf.mxu2 }
 0x222   : > { %v1013_v37 = vpop.f32.mrf.mxu3  ;;  %v1059_v36 = vld [vmem:[%s3487_s9 + $0x8] sm:$0xff] }
 0x223   : > { %1422 = vrot.lane.b32.xlu0 %v1420_v30, %s3018_s6  ;;  %1358 = vrot.lane.b32.xlu1 %v1013_v37, %s3018_s6  ;;  %v3481_v41 = vpop.f32.mrf.mxu1  ;;  %v1062_v30 = vld [vmem:[%s3487_s9 + $0x20] sm:$0xff] }
 0x229   : > { %v933_v49 = vpop.f32.mrf.mxu2 }
 0x22a   : > { %v1016_v53 = vpop.f32.mrf.mxu3  ;;  %v1584_v49 = vld [vmem:[#allocation2 + $0x1e0] sm:$0xff] }
 0x22b   : > { %1077 = vperm.xlu0 %2841, %v1058_v47   ;;  %1360 = vrot.lane.b32.xlu1 %v1016_v53, %s3018_s6  ;;  %v3491_v54 = vpop.f32.mrf.mxu1  ;;  %v1063_v53 = vld [vmem:[%s3487_s9 + $0x28] sm:$0xff] }
 0x22c   : > { %1678 = vmatpush.msrb.mxu3 %v1584_v49  ;;  %v1462_v49 = vld [vmem:[#allocation2 + $0x160] sm:$0xff] }
 0x231   : > { %v935_v1 = vpop.f32.mrf.mxu2 }
 0x232   : > { %v1019_v6 = vpop.f32.mrf.mxu3  ;;  %v1463_v1 = vld [vmem:[#allocation2 + $0x170] sm:$0xff] }
 0x233   : > { %1083 = vperm.xlu0 %2841, %v1060_v61   ;;  %1362 = vrot.lane.b32.xlu2 %v1019_v6, %s3018_s6  ;;  %v978_v7 = vpop.f32.mrf.mxu1 }
 0x234   : > { %1523 = vmatpush.msrb.mxu2 %v1463_v1  ;;  %v1064_v7 = vld [vmem:[%s3487_s9 + $0x30] sm:$0xff] }
 0x235   : > { %v1068_v1 = vld [vmem:[%s3487_s9 + $0x50] sm:$0xff] }
 0x236   : > { %1524 = vmatpush.msrb.mxu2 %v1462_v49 }
 0x239   : > { %v937_v18 = vpop.f32.mrf.mxu2 }
 0x23a   : > { %v1022_v24 = vpop.f32.mrf.mxu3 }
 0x23b   : > { %1086 = vperm.xlu0 %2841, %v1061_v11   ;;  %1364 = vrot.lane.b32.xlu2 %v1022_v24, %s3018_s6  ;;  %v980_v29 = vpop.f32.mrf.mxu1  ;;  %v1065_v24 = vld [vmem:[%s3487_s9 + $0x38] sm:$0xff] }
 0x241   : > { %v939_v37 = vpop.f32.mrf.mxu2 }
 0x242   : > { %v1025_v43 = vpop.f32.mrf.mxu3  ;;  %v1066_v37 = vld [vmem:[%s3487_s9 + $0x40] sm:$0xff] }
 0x243   : > { %1089 = vperm.xlu0 %2841, %v1062_v30   ;;  %1080 = vperm.xlu2 %2842, %v1059_v36   ;;  %v982_v47 = vpop.f32.mrf.mxu1  ;;  %v1583_v36 = vld [vmem:[#allocation2 + $0x1d0] sm:$0xff] }
 0x244   : > { %1366 = vrot.lane.b32.xlu1 %v1025_v43, %s3018_s6  ;;  %1679 = vmatpush.msrb.mxu3 %v1583_v36 }
 0x249   : > { %v941_v31 = vpop.f32.mrf.mxu2 }
 0x24a   : > { %v1028_v61 = vpop.f32.mrf.mxu3 }
 0x24b   : > { %1092 = vperm.xlu0 %2841, %v1063_v53   ;;  %1368 = vrot.lane.b32.xlu2 %v1028_v61, %s3018_s6  ;;  %v984_v6 = vpop.f32.mrf.mxu1  ;;  %v1067_v53 = vld [vmem:[%s3487_s9 + $0x48] sm:$0xff] }
 0x251   : > { %v943_v11 = vpop.f32.mrf.mxu2 }
 0x252   : > { %v1031_v18 = vpop.f32.mrf.mxu3  ;;  %v1069_v11 = vld [vmem:[%s3487_s9 + $0x58] sm:$0xff] }
 0x253   : > { %1095 = vperm.xlu0 %2841, %v1064_v7   ;;  %1370 = vrot.lane.b32.xlu2 %v1031_v18, %s3018_s6 }
 0x259   : > { %v945_v29 = vpop.f32.mrf.mxu2 }
 0x25a   : > { %v1034_v30 = vpop.f32.mrf.mxu3  ;;  %v1582_v29 = vld [vmem:[#allocation2 + $0x1c0] sm:$0xff] }
 0x25b   : > { %1098 = vperm.xlu0 %2841, %v1065_v24   ;;  %1372 = vrot.lane.b32.xlu2 %v1034_v30, %s3018_s6 }
 0x25c   : > { %1680 = vmatpush.msrb.mxu3 %v1582_v29 }
 0x261   : > { %v947_v43 = vpop.f32.mrf.mxu2 }
 0x262   : > { %v1037_v47 = vpop.f32.mrf.mxu3 }
 0x263   : > { %1101 = vperm.xlu0 %2841, %v1066_v37   ;;  %1374 = vrot.lane.b32.xlu2 %v1037_v47, %s3018_s6  ;;  %v1461_v37 = vld [vmem:[#allocation2 + $0x150] sm:$0xff] }
 0x264   : > { %1525 = vmatpush.msrb.mxu2 %v1461_v37 }
 0x269   : > { %v949_v31 = vpop.f32.mrf.mxu2 }
 0x26a   : > { %v1040_v61 = vpop.f32.mrf.mxu3 }
 0x26b   : > { %1104 = vperm.xlu0 %2841, %v1067_v53   ;;  %1376 = vrot.lane.b32.xlu2 %v1040_v61, %s3018_s6 }
 0x271   : > { %v951_v6 = vpop.f32.mrf.mxu2 }
 0x272   : > { %v1043_v7 = vpop.f32.mrf.mxu3 }
 0x273   : > { %1107 = vperm.xlu0 %2841, %v1068_v1   ;;  %1378 = vrot.lane.b32.xlu2 %v1043_v7, %s3018_s6 }
 0x279   : > { %v953_v18 = vpop.f32.mrf.mxu2 }
 0x27a   : > { %v1046_v24 = vpop.f32.mrf.mxu3 }
 0x27b   : > { %1110 = vperm.xlu0 %2841, %v1069_v11   ;;  %1380 = vrot.lane.b32.xlu2 %v1046_v24, %s3018_s6  ;;  %v1074_v24 = vlaneseq }
 0x27d   : > { %v3524_v37 = vand.u32 127, %v1074_v24  ;;  %v1460_v24 = vld [vmem:[#allocation2 + $0x140] sm:$0xff] }
 0x27e   : > { %1526 = vmatpush.msrb.mxu2 %v1460_v24 }
 0x27f   : > { %4729 = vst [vmem:[#allocation7_spill] sm:$0xff] %v3524_v37 }
 0x281   : > { %v955_v30 = vpop.f32.mrf.mxu2 }
 0x282   : > { %v1049_v36 = vpop.f32.mrf.mxu3 }
 0x283   : > { %1382 = vrot.lane.b32.xlu2 %v1049_v36, %s3018_s6  ;;  %v1070_v36 = vld [vmem:[%s3487_s9 + $0x60] sm:$0xff] }
 0x289   : > { %v957_v43 = vpop.f32.mrf.mxu2 }
 0x28a   : > { %v1052_v47 = vpop.f32.mrf.mxu3  ;;  %v1581_v43 = vld [vmem:[#allocation2 + $0x1b0] sm:$0xff] }
 0x28b   : > { %1384 = vrot.lane.b32.xlu2 %v1052_v47, %s3018_s6  ;;  %1681 = vmatpush.msrb.mxu3 %v1581_v43 }
 0x28d   : > { %v1357_v49 = vpop.permute.xlu0 %1356  ;;  %v1363_v53 = vpop.permute.xlu2 %1362 }
 0x28e   : > { %v1404_v1 = vadd.f32 %v1357_v49, %v3474_v23 }
 0x291   : > { %v959_v31 = vpop.f32.mrf.mxu2 }
 0x292   : > { %v1055_v61 = vpop.f32.mrf.mxu3 }
 0x293   : > { %1386 = vrot.lane.b32.xlu2 %v1055_v61, %s3018_s6 }
 0x295   : > { %v3518_v6 = vpop.permute.xlu0 %1422  ;;  %v1359_v7 = vpop.permute.xlu1 %1358 }
 0x296   : > { %v1365_v11 = vpop.permute.xlu2 %1364  ;;  %v1425_v18 = vadd.f32 %v3518_v6, %v1404_v1  ;;  %v1405_v29 = vadd.f32 %v1359_v7, %v3477_v60  ;;  %v4714_v1 = vmov 0.0  }
 0x297   : > { %v1408_v24 = vadd.f32 %v1365_v11, %v3367_v56 }
 0x298   : > { %v1441_v30 = vmax.f32 %v1425_v18, 0.0  ;;  %v1426_v47 = vadd.f32 %v3518_v6, %v1405_v29 }
 0x29a   : > { %1604 = vrot.lane.b32.xlu1 %v1441_v30, %s3018_s6  ;;  %v1442_v18 = vmax.f32 %v1426_v47, 0.0  ;;  %v1407_v47 = vadd.f32 %v1363_v53, %v3491_v54  ;;  %v1429_v53 = vadd.f32 %v3518_v6, %v1408_v24 }
 0x29b   : > { %1113 = vperm.xlu2 %2842, %v1070_v36  }
 0x29c   : > { %v1445_v26 = vmax.f32 %v1429_v53, 0.0 }
 0x29d   : > { %v1078_v49 = vpop.permute.xlu0 %1077  ;;  %v1361_v31 = vpop.permute.xlu1 %1360 }
 0x29e   : > { %vm1124_vm4 = vcmp.eq.s32.totalorder %v3524_v37, %v1078_v49  ;;  %v1081_v61 = vpop.permute.xlu2 %1080  ;;  %v1406_v30 = vadd.f32 %v1361_v31, %v3481_v41  ;;  %v1428_v31 = vadd.f32 %v3518_v6, %v1407_v47 }
 0x29f   : > { %v3529_v7 = vsel %vm1124_vm4, 1.0, %v4714_v1  ;;  %vm1125_vm5 = vcmp.eq.s32.totalorder %v3524_v37, %v1081_v61 }
 0x2a0   : > { %4730 = vst [vmem:[#allocation8_spill] sm:$0xff] %v3529_v7  ;;  %2755 = vmatmul.msk.f32.vlgmr.msrb.gmra.mxu0 %vm1173_vm3, %v3529_v7  ;;  %v1427_v29 = vadd.f32 %v3518_v6, %v1406_v30  ;;  %v3538_v36 = vsel %vm1125_vm5, 1.0, %v4714_v1 }
 0x2a1   : > { %4731 = vst [vmem:[#allocation9_spill] sm:$0xff] %v3538_v36 }
 0x2a2   : > { %1606 = vrot.lane.b32.xlu1 %v1442_v18, %s3018_s6  ;;  %v1443_v12 = vmax.f32 %v1427_v29, 0.0  ;;  %v1444_v29 = vmax.f32 %v1428_v31, 0.0  ;;  %v1459_v31 = vld [vmem:[#allocation2 + $0x130] sm:$0xff] }
 0x2a3   : > { %1527 = vmatpush.msrb.mxu2 %v1459_v31 }
 0x2a5   : > { %v1084_v43 = vpop.permute.xlu0 %1083 }
 0x2a6   : > { %v1369_v49 = vpop.permute.xlu2 %1368  ;;  %vm1126_vm6 = vcmp.eq.s32.totalorder %v3524_v37, %v1084_v43  ;;  %v1580_v43 = vld [vmem:[#allocation2 + $0x1a0] sm:$0xff] }
 0x2a7   : > { %v3547_v30 = vsel %vm1126_vm6, 1.0, %v4714_v1  ;;  %1682 = vmatpush.msrb.mxu3 %v1580_v43  ;;  %v1410_v53 = vadd.f32 %v1369_v49, %v3389_v15 }
 0x2a8   : > { %2756 = vmatmul.msk.f32.gmra.mxu0 %vm1173_vm3, %v3538_v36  ;;  %4732 = vst [vmem:[#allocation10_spill] sm:$0xff] %v3547_v30 }
 0x2aa   : > { %1608 = vrot.lane.b32.xlu1 %v1443_v12, %s3018_s6 }
 0x2ad   : > { %v1087_v61 = vpop.permute.xlu0 %1086 }
 0x2ae   : > { %v1371_v18 = vpop.permute.xlu2 %1370  ;;  %vm1127_vm7 = vcmp.eq.s32.totalorder %v3524_v37, %v1087_v61 }
 0x2af   : > { %v3556_v7 = vsel %vm1127_vm7, 1.0, %v4714_v1 }
 0x2b0   : > { %2757 = vmatmul.msk.f32.gmra.mxu0 %vm1173_vm3, %v3547_v30  ;;  %4733 = vst [vmem:[#allocation11_spill] sm:$0xff] %v3556_v7 }
 0x2b2   : > { %1610 = vrot.lane.b32.xlu1 %v1444_v29, %s3018_s6 }
 0x2b5   : > { %v1090_v12 = vpop.permute.xlu0 %1089 }
 0x2b6   : > { %v1367_v47 = vpop.permute.xlu1 %1366  ;;  %v1373_v36 = vpop.permute.xlu2 %1372  ;;  %vm1128_vm8 = vcmp.eq.s32.totalorder %v3524_v37, %v1090_v12 }
 0x2b7   : > { %v1409_v11 = vadd.f32 %v1367_v47, %v3378_v10  ;;  %v3565_v43 = vsel %vm1128_vm8, 1.0, %v4714_v1 }
 0x2b8   : > { %2758 = vmatmul.msk.f32.gmra.mxu0 %vm1173_vm3, %v3556_v7  ;;  %4734 = vst [vmem:[#allocation12_spill] sm:$0xff] %v3565_v43  ;;  %v1411_v7 = vadd.f32 %v1371_v18, %v3400_v21 }
 0x2b9   : > { %v1430_v61 = vadd.f32 %v3518_v6, %v1409_v11 }
 0x2ba   : > { %1612 = vrot.lane.b32.xlu1 %v1445_v26, %s3018_s6  ;;  %v1431_v26 = vadd.f32 %v3518_v6, %v1410_v53  ;;  %v1432_v49 = vadd.f32 %v3518_v6, %v1411_v7 }
 0x2bb   : > { %v1446_v30 = vmax.f32 %v1430_v61, 0.0 }
 0x2bc   : > { %v1447_v31 = vmax.f32 %v1431_v26, 0.0  ;;  %v1412_v26 = vadd.f32 %v1373_v36, %v3409_v28 }
 0x2bd   : > { %v1093_v24 = vpop.permute.xlu0 %1092 }
 0x2be   : > { %v1375_v29 = vpop.permute.xlu2 %1374  ;;  %vm1129_vm9 = vcmp.eq.s32.totalorder %v3524_v37, %v1093_v24 }
 0x2bf   : > { %v3574_v11 = vsel %vm1129_vm9, 1.0, %v4714_v1 }
 0x2c0   : > { %2759 = vmatmul.msk.f32.gmra.mxu0 %vm1173_vm3, %v3565_v43  ;;  %v1448_v43 = vmax.f32 %v1432_v49, 0.0 }
 0x2c2   : > { %1614 = vrot.lane.b32.xlu1 %v1446_v30, %s3018_s6 }
 0x2c5   : > { %v1096_v12 = vpop.permute.xlu0 %1095 }
 0x2c6   : > { %v1377_v47 = vpop.permute.xlu2 %1376  ;;  %vm1130_vm10 = vcmp.eq.s32.totalorder %v3524_v37, %v1096_v12  ;;  %v1579_v12 = vld [vmem:[#allocation2 + $0x190] sm:$0xff] }
 0x2c7   : > { %v3583_v24 = vsel %vm1130_vm10, 1.0, %v4714_v1  ;;  %1683 = vmatpush.msrb.mxu3 %v1579_v12 }
 0x2c8   : > { %2760 = vmatmul.msk.f32.gmra.mxu0 %vm1173_vm3, %v3574_v11  ;;  %4735 = vst [vmem:[#allocation13_spill] sm:$0xff] %v3583_v24 }
 0x2ca   : > { %1616 = vrot.lane.b32.xlu1 %v1447_v31, %s3018_s6  ;;  %v1433_v31 = vadd.f32 %v3518_v6, %v1412_v26 }
 0x2cd   : > { %v1099_v30 = vpop.permute.xlu0 %1098 }
 0x2ce   : > { %v1379_v61 = vpop.permute.xlu2 %1378  ;;  %vm1131_vm11 = vcmp.eq.s32.totalorder %v3524_v37, %v1099_v30  ;;  %v1072_v30 = vld [vmem:[%s3487_s9 + $0x70] sm:$0xff] }
 0x2cf   : > { %v1415_v53 = vadd.f32 %v1379_v61, %v3436_v46  ;;  %v3595_v36 = vsel %vm1131_vm11, 1.0, %v4714_v1 }
 0x2d0   : > { %2761 = vmatmul.msk.f32.gmra.mxu0 %vm1173_vm3, %v3583_v24  ;;  %4736 = vst [vmem:[#allocation14_spill] sm:$0xff] %v3595_v36 }
 0x2d1   : > { %v1436_v18 = vadd.f32 %v3518_v6, %v1415_v53  ;;  %v1449_v53 = vmax.f32 %v1433_v31, 0.0 }
 0x2d2   : > { %1618 = vrot.lane.b32.xlu1 %v1448_v43, %s3018_s6  ;;  %v1413_v43 = vadd.f32 %v1375_v29, %v3418_v35 }
 0x2d3   : > { %v1452_v7 = vmax.f32 %v1436_v18, 0.0  ;;  %v1458_v18 = vld [vmem:[#allocation2 + $0x120] sm:$0xff] }
 0x2d4   : > { %1528 = vmatpush.msrb.mxu2 %v1458_v18  ;;  %v1434_v12 = vadd.f32 %v3518_v6, %v1413_v43 }
 0x2d5   : > { %1626 = vrot.lane.b32.xlu0 %v1452_v7, %s3018_s6  ;;  %v1102_v49 = vpop.permute.xlu0 %1101 }
 0x2d6   : > { %v1381_v61 = vpop.permute.xlu2 %1380  ;;  %vm1132_vm12 = vcmp.eq.s32.totalorder %v3524_v37, %v1102_v49 }
 0x2d7   : > { %v1416_v24 = vadd.f32 %v1381_v61, %v3445_v51  ;;  %v3608_v61 = vsel %vm1132_vm12, 1.0, %v4714_v1 }
 0x2d8   : > { %2762 = vmatmul.msk.f32.gmra.mxu0 %vm1173_vm3, %v3595_v36  ;;  %v1414_v36 = vadd.f32 %v1377_v47, %v3427_v40 }
 0x2d9   : > { %v1437_v26 = vadd.f32 %v3518_v6, %v1416_v24  ;;  %v1450_v24 = vmax.f32 %v1434_v12, 0.0  ;;  %v1457_v12 = vld [vmem:[#allocation2 + $0x110] sm:$0xff] }
 0x2da   : > { %1620 = vrot.lane.b32.xlu1 %v1449_v53, %s3018_s6  ;;  %v1073_v53 = vld [vmem:[%s3487_s9 + $0x78] sm:$0xff]  ;;  %v1435_v43 = vadd.f32 %v3518_v6, %v1414_v36  ;;  %1529 = vmatpush.msrb.mxu2 %v1457_v12 }
 0x2db   : > { %v1453_v7 = vmax.f32 %v1437_v26, 0.0 }
 0x2dc   : > { %v1451_v47 = vmax.f32 %v1435_v43, 0.0 }
 0x2dd   : > { %1119 = vperm.xlu0 %2841, %v1072_v30   ;;  %1628 = vrot.lane.b32.xlu2 %v1453_v7, %s3018_s6  ;;  %v1105_v29 = vpop.permute.xlu0 %1104 }
 0x2de   : > { %v1383_v31 = vpop.permute.xlu2 %1382  ;;  %vm1133_vm13 = vcmp.eq.s32.totalorder %v3524_v37, %v1105_v29 }
 0x2df   : > { %v3618_v26 = vsel %vm1133_vm13, 1.0, %v4714_v1  ;;  %v1417_v43 = vadd.f32 %v1383_v31, %v3454_v57 }
 0x2e0   : > { %2763 = vmatmul.msk.f32.gmra.mxu0 %vm1173_vm3, %v3608_v61 }
 0x2e2   : > { %1622 = vrot.lane.b32.xlu1 %v1450_v24, %s3018_s6 }
 0x2e5   : > { %1122 = vperm.xlu2 %2842, %v1073_v53   ;;  %v1108_v18 = vpop.permute.xlu0 %1107  ;;  %v1071_v53 = vld [vmem:[%s3487_s9 + $0x68] sm:$0xff] }
 0x2e6   : > { %v1385_v49 = vpop.permute.xlu2 %1384  ;;  %vm1134_vm14 = vcmp.eq.s32.totalorder %v3524_v37, %v1108_v18 }
 0x2e7   : > { %v1418_v30 = vadd.f32 %v1385_v49, %v3463_v3  ;;  %v3628_v29 = vsel %vm1134_vm14, 1.0, %v4714_v1 }
 0x2e8   : > { %2764 = vmatmul.msk.f32.gmra.mxu0 %vm1173_vm3, %v3618_v26 }
 0x2e9   : > { %v1439_v7 = vadd.f32 %v3518_v6, %v1418_v30  ;;  %v1438_v30 = vadd.f32 %v3518_v6, %v1417_v43 }
 0x2ea   : > { %1624 = vrot.lane.b32.xlu1 %v1451_v47, %s3018_s6 }
 0x2eb   : > { %v1455_v36 = vmax.f32 %v1439_v7, 0.0  ;;  %v1454_v47 = vmax.f32 %v1438_v30, 0.0 }
 0x2ed   : > { %1632 = vrot.lane.b32.xlu0 %v1455_v36, %s3018_s6  ;;  %v1111_v49 = vpop.permute.xlu0 %1110 }
 0x2ee   : > { %v1387_v24 = vpop.permute.xlu2 %1386  ;;  %vm1135_vm15 = vcmp.eq.s32.totalorder %v3524_v37, %v1111_v49 }
 0x2ef   : > { %v3637_v18 = vsel %vm1135_vm15, 1.0, %v4714_v1  ;;  %v1419_v7 = vadd.f32 %v1387_v24, %v3472_v17 }
 0x2f0   : > { %2765 = vmatmul.msk.f32.gmra.mxu0 %vm1173_vm3, %v3628_v29  ;;  %4737 = vst [vmem:[#allocation15_spill] sm:$0xff] %v3637_v18 }
 0x2f1   : > { %v1440_v31 = vadd.f32 %v3518_v6, %v1419_v7  ;;  %v3653_v6 = vld [vmem:[#allocation2 + $0x230] ss:$0 sm:$0xff] }
 0x2f2   : > { %1116 = vperm.xlu1 %2843, %v1071_v53  }
 0x2f3   : > { %v1456_v53 = vmax.f32 %v1440_v31, 0.0 }
 0x2f6   : > { %v1114_v36 = vpop.permute.xlu2 %1113 }
 0x2f7   : > { %vm1136_vm2 = vcmp.eq.s32.totalorder %v3524_v37, %v1114_v36 }
 0x2f8   : > { %2766 = vmatmul.msk.f32.gmra.mxu0 %vm1173_vm3, %v3637_v18  ;;  %v3646_v12 = vsel %vm1136_vm2, 1.0, %v4714_v1 }
 0x2f9   : > { %4738 = vst [vmem:[#allocation16_spill] sm:$0xff] %v3646_v12 }
 0x2fa   : > { %1630 = vrot.lane.b32.xlu1 %v1454_v47, %s3018_s6 }
 0x300   : > { %2767 = vmatmul.msk.f32.gmra.mxu0 %vm1173_vm3, %v3646_v12 }
 0x302   : > { %1634 = vrot.lane.b32.xlu1 %v1456_v53, %s3018_s6 }
 0x30c   : > { %v1605_v24 = vpop.permute.xlu1 %1604 }
 0x30d   : > { %2787 = vmatmul.msk.f32.vlgmr.msrb.gmra.mxu3 %vm550_vm1, %v1605_v24 }
 0x314   : > { %v1607_v43 = vpop.permute.xlu1 %1606 }
 0x315   : > { %2788 = vmatmul.msk.f32.gmra.mxu3 %vm550_vm1, %v1607_v43 }
 0x31c   : > { %v1609_v49 = vpop.permute.xlu1 %1608 }
 0x31d   : > { %v1243_v30 = vpop.f32.mrf.mxu0  ;;  %2789 = vmatmul.msk.f32.gmra.mxu3 %vm550_vm1, %v1609_v49 }
 0x31e   : > { %v1291_v47 = vadd.f32 %v1243_v30, %v3474_v23 }
 0x320   : > { %v1308_v7 = vadd.f32 %v3653_v6, %v1291_v47 }
 0x322   : > { %v1324_v36 = vmax.f32 %v1308_v7, 0.0 }
 0x324   : > { %2771 = vmatmul.msk.f32.vlgmr.msrb.gmra.mxu2 %vm550_vm1, %v1324_v36  ;;  %v1611_v31 = vpop.permute.xlu1 %1610 }
 0x325   : > { %v1246_v53 = vpop.f32.mrf.mxu0  ;;  %2790 = vmatmul.msk.f32.gmra.mxu3 %vm550_vm1, %v1611_v31 }
 0x326   : > { %v1292_v24 = vadd.f32 %v1246_v53, %v3477_v60 }
 0x328   : > { %v1309_v43 = vadd.f32 %v3653_v6, %v1292_v24 }
 0x32a   : > { %v1325_v1 = vmax.f32 %v1309_v43, 0.0 }
 0x32c   : > { %2772 = vmatmul.msk.f32.gmra.mxu2 %vm550_vm1, %v1325_v1  ;;  %v1613_v12 = vpop.permute.xlu1 %1612 }
 0x32d   : > { %v1249_v49 = vpop.f32.mrf.mxu0  ;;  %2791 = vmatmul.msk.f32.gmra.mxu3 %vm550_vm1, %v1613_v12 }
 0x32e   : > { %v1293_v23 = vadd.f32 %v1249_v49, %v3481_v41 }
 0x330   : > { %v1310_v30 = vadd.f32 %v3653_v6, %v1293_v23 }
 0x332   : > { %v1326_v47 = vmax.f32 %v1310_v30, 0.0 }
 0x334   : > { %2773 = vmatmul.msk.f32.gmra.mxu2 %vm550_vm1, %v1326_v47  ;;  %v1615_v7 = vpop.permute.xlu1 %1614 }
 0x335   : > { %v1252_v36 = vpop.f32.mrf.mxu0  ;;  %2792 = vmatmul.msk.f32.gmra.mxu3 %vm550_vm1, %v1615_v7 }
 0x336   : > { %v1294_v60 = vadd.f32 %v1252_v36, %v3491_v54 }
 0x338   : > { %v1311_v31 = vadd.f32 %v3653_v6, %v1294_v60 }
 0x33a   : > { %v1327_v1 = vmax.f32 %v1311_v31, 0.0 }
 0x33c   : > { %v1617_v53 = vpop.permute.xlu1 %1616  ;;  %2774 = vmatmul.msk.f32.gmra.mxu2 %vm550_vm1, %v1327_v1 }
 0x33d   : > { %v1255_v12 = vpop.f32.mrf.mxu0  ;;  %2793 = vmatmul.msk.f32.gmra.mxu3 %vm550_vm1, %v1617_v53 }
 0x33e   : > { %v1295_v41 = vadd.f32 %v1255_v12, %v3367_v56 }
 0x340   : > { %v1312_v24 = vadd.f32 %v3653_v6, %v1295_v41 }
 0x342   : > { %v1328_v43 = vmax.f32 %v1312_v24, 0.0 }
 0x344   : > { %v1619_v49 = vpop.permute.xlu1 %1618  ;;  %2775 = vmatmul.msk.f32.gmra.mxu2 %vm550_vm1, %v1328_v43 }
 0x345   : > { %v1258_v23 = vpop.f32.mrf.mxu0  ;;  %2794 = vmatmul.msk.f32.gmra.mxu3 %vm550_vm1, %v1619_v49 }
 0x346   : > { %v1296_v54 = vadd.f32 %v1258_v23, %v3378_v10 }
 0x348   : > { %v1313_v30 = vadd.f32 %v3653_v6, %v1296_v54 }
 0x34a   : > { %v1329_v47 = vmax.f32 %v1313_v30, 0.0 }
 0x34c   : > { %v1621_v7 = vpop.permute.xlu1 %1620  ;;  %2776 = vmatmul.msk.f32.gmra.mxu2 %vm550_vm1, %v1329_v47  ;;  %v1629_v47 = vpop.permute.xlu2 %1628 }
 0x34d   : > { %v1261_v36 = vpop.f32.mrf.mxu0  ;;  %2795 = vmatmul.msk.f32.gmra.mxu3 %vm550_vm1, %v1621_v7  ;;  %v4739_v7 = vmov 0.0  }
 0x34e   : > { %v1297_v56 = vadd.f32 %v1261_v36, %v3389_v15  ;;  %v1627_v15 = vpop.permute.xlu0 %1626 }
 0x350   : > { %v1314_v60 = vadd.f32 %v3653_v6, %v1297_v56 }
 0x352   : > { %v1330_v31 = vmax.f32 %v1314_v60, 0.0 }
 0x354   : > { %v1623_v1 = vpop.permute.xlu1 %1622  ;;  %2777 = vmatmul.msk.f32.gmra.mxu2 %vm550_vm1, %v1330_v31 }
 0x355   : > { %v1264_v53 = vpop.f32.mrf.mxu0  ;;  %2796 = vmatmul.msk.f32.gmra.mxu3 %vm550_vm1, %v1623_v1 }
 0x356   : > { %v1298_v10 = vadd.f32 %v1264_v53, %v3400_v21 }
 0x358   : > { %v1315_v12 = vadd.f32 %v3653_v6, %v1298_v10 }
 0x35a   : > { %v1331_v41 = vmax.f32 %v1315_v12, 0.0 }
 0x35c   : > { %v1625_v24 = vpop.permute.xlu1 %1624  ;;  %2778 = vmatmul.msk.f32.gmra.mxu2 %vm550_vm1, %v1331_v41 }
 0x35d   : > { %v1267_v43 = vpop.f32.mrf.mxu0  ;;  %2797 = vmatmul.msk.f32.gmra.mxu3 %vm550_vm1, %v1625_v24 }
 0x35e   : > { %v1299_v49 = vadd.f32 %v1267_v43, %v3409_v28  ;;  %v1120_v28 = vpop.permute.xlu0 %1119 }
 0x35f   : > { %vm1138_vm5 = vcmp.eq.s32.totalorder %v3524_v37, %v1120_v28 }
 0x360   : > { %v1316_v23 = vadd.f32 %v3653_v6, %v1299_v49  ;;  %v3704_v53 = vsel %vm1138_vm5, 1.0, %v4739_v7 }
 0x361   : > { %4740 = vst [vmem:[#allocation17_spill] sm:$0xff] %v3704_v53 }
 0x362   : > { %v1332_v54 = vmax.f32 %v1316_v23, 0.0 }
 0x364   : > { %v1117_v30 = vpop.permute.xlu1 %1116  ;;  %2779 = vmatmul.msk.f32.gmra.mxu2 %vm550_vm1, %v1332_v54 }
 0x365   : > { %vm1137_vm4 = vcmp.eq.s32.totalorder %v3524_v37, %v1117_v30  ;;  %v1270_v21 = vpop.f32.mrf.mxu0  ;;  %2798 = vmatmul.msk.f32.gmra.mxu3 %vm550_vm1, %v1627_v15 }
 0x366   : > { %v3694_v36 = vsel %vm1137_vm4, 1.0, %v4739_v7  ;;  %v1300_v56 = vadd.f32 %v1270_v21, %v3418_v35  ;;  %v1123_v35 = vpop.permute.xlu2 %1122  ;;  %v1633_v54 = vpop.permute.xlu0 %1632 }
 0x367   : > { %2768 = vmatmul.msk.f32.gmra.mxu0 %vm1173_vm3, %v3694_v36  ;;  %vm1139_vm6 = vcmp.eq.s32.totalorder %v3524_v37, %v1123_v35 }
 0x368   : > { %v1317_v60 = vadd.f32 %v3653_v6, %v1300_v56  ;;  %v3714_v15 = vsel %vm1139_vm6, 1.0, %v4739_v7 }
 0x369   : > { %4741 = vst [vmem:[#allocation18_spill] sm:$0xff] %v3714_v15 }
 0x36a   : > { %v1333_v31 = vmax.f32 %v1317_v60, 0.0 }
 0x36c   : > { %2780 = vmatmul.msk.f32.gmra.mxu2 %vm550_vm1, %v1333_v31  ;;  %v1631_v24 = vpop.permute.xlu1 %1630  ;;  %v3728_v31 = vld [vmem:[#allocation2 + $0x240] ss:$0 sm:$0xff] }
 0x36d   : > { %v1273_v1 = vpop.f32.mrf.mxu0  ;;  %2799 = vmatmul.msk.f32.gmra.mxu3 %vm550_vm1, %v1629_v47 }
 0x36e   : > { %v1301_v10 = vadd.f32 %v1273_v1, %v3427_v40 }
 0x36f   : > { %2769 = vmatmul.msk.f32.gmra.mxu0 %vm1173_vm3, %v3704_v53 }
 0x370   : > { %v1318_v12 = vadd.f32 %v3653_v6, %v1301_v10 }
 0x372   : > { %v1334_v41 = vmax.f32 %v1318_v12, 0.0 }
 0x374   : > { %2781 = vmatmul.msk.f32.gmra.mxu2 %vm550_vm1, %v1334_v41  ;;  %v1635_v56 = vpop.permute.xlu1 %1634 }
 0x375   : > { %v1276_v43 = vpop.f32.mrf.mxu0  ;;  %2800 = vmatmul.msk.f32.gmra.mxu3 %vm550_vm1, %v1631_v24 }
 0x376   : > { %v1302_v40 = vadd.f32 %v1276_v43, %v3436_v46 }
 0x377   : > { %2770 = vmatmul.msk.f32.gmra.mxu0 %vm1173_vm3, %v3714_v15 }
 0x378   : > { %v1319_v49 = vadd.f32 %v3653_v6, %v1302_v40 }
 0x37a   : > { %v1335_v23 = vmax.f32 %v1319_v49, 0.0 }
 0x37c   : > { %2782 = vmatmul.msk.f32.gmra.mxu2 %vm550_vm1, %v1335_v23 }
 0x37d   : > { %v1279_v30 = vpop.f32.mrf.mxu0  ;;  %2801 = vmatmul.msk.f32.gmra.mxu3 %vm550_vm1, %v1633_v54 }
 0x37e   : > { %v1303_v21 = vadd.f32 %v1279_v30, %v3445_v51 }
 0x380   : > { %v1320_v47 = vadd.f32 %v3653_v6, %v1303_v21 }
 0x382   : > { %v1336_v7 = vmax.f32 %v1320_v47, 0.0 }
 0x384   : > { %2783 = vmatmul.msk.f32.gmra.mxu2 %vm550_vm1, %v1336_v7 }
 0x385   : > { %2802 = vmatmul.msk.f32.gmra.mxu3 %vm550_vm1, %v1635_v56 }
 0x390   : > { %v1685_v46 = vpop.f32.mrf.mxu3 }
 0x398   : > { %v1688_v28 = vpop.f32.mrf.mxu3 }
 0x3a0   : > { %v3726_v60 = vpop.f32.mrf.mxu3 }
 0x3a7   : > { %v1531_v1 = vpop.f32.mrf.mxu2 }
 0x3a8   : > { %v1532_v10 = vadd.f32 %v1531_v1, %v3728_v31  ;;  %v1694_v35 = vpop.f32.mrf.mxu3 }
 0x3aa   : > { %v1733_v51 = vadd.f32 %v1532_v10, %v3308_v58 }
 0x3ac   : > { %v1749_v12 = vsub.f32 %v1733_v51, %v3311_v32 }
 0x3ae   : > { %v1765_v41 = vmul.f32 %v1749_v12, %v1749_v12 }
 0x3af   : > { %v1534_v24 = vpop.f32.mrf.mxu2 }
 0x3b0   : > { %v1535_v43 = vadd.f32 %v1534_v24, %v3728_v31  ;;  %v1697_v40 = vpop.f32.mrf.mxu3  ;;  %v1781_v49 = vsel %vm299_vm0, %v1765_v41, 0.0 }
 0x3b1   : > { %1782 = vadd.xlane.f32.xlu2 %v1781_v49 }
 0x3b2   : > { %v1734_v23 = vadd.f32 %v1535_v43, %v3321_v59 }
 0x3b4   : > { %v1750_v54 = vsub.f32 %v1734_v23, %v3324_v42  ;;  %v3743_v42 = vld [vmem:[#allocation2 + $0x260] ss:$0 sm:$0xff] }
 0x3b5   : > { %v3747_v24 = vadd.f32 %v1685_v46, %v3743_v42 }
 0x3b6   : > { %v1766_v30 = vmul.f32 %v1750_v54, %v1750_v54 }
 0x3b7   : > { %v1537_v21 = vpop.f32.mrf.mxu2  ;;  %v1829_v54 = vsel %vm1173_vm3, %v3747_v24, -inf }
 0x3b8   : > { %v1538_v47 = vadd.f32 %v1537_v21, %v3728_v31  ;;  %v1700_v7 = vpop.f32.mrf.mxu3  ;;  %v1784_v58 = vsel %vm299_vm0, %v1766_v30, 0.0 }
 0x3b9   : > { %1785 = vadd.xlane.f32.xlu0 %v1784_v58 }
 0x3ba   : > { %v1735_v32 = vadd.f32 %v1538_v47, %v3334_v62 }
 0x3bc   : > { %v1751_v56 = vsub.f32 %v1735_v32, %v3337_v48 }
 0x3be   : > { %v1767_v1 = vmul.f32 %v1751_v56, %v1751_v56 }
 0x3bf   : > { %v1540_v10 = vpop.f32.mrf.mxu2 }
 0x3c0   : > { %v1541_v51 = vadd.f32 %v1540_v10, %v3728_v31  ;;  %v1703_v12 = vpop.f32.mrf.mxu3  ;;  %v1787_v59 = vsel %vm299_vm0, %v1767_v1, 0.0 }
 0x3c1   : > { %1788 = vadd.xlane.f32.xlu1 %v1787_v59 }
 0x3c2   : > { %v1736_v41 = vadd.f32 %v1541_v51, %v3347_v52  ;;  %v3756_v52 = vadd.f32 %v1694_v35, %v3743_v42 }
 0x3c4   : > { %v1752_v43 = vsub.f32 %v1736_v41, %v3350_v2  ;;  %v1838_v56 = vsel %vm1173_vm3, %v3756_v52, -inf }
 0x3c6   : > { %v1768_v62 = vmul.f32 %v1752_v43, %v1752_v43 }
 0x3c7   : > { %v1543_v49 = vpop.f32.mrf.mxu2 }
 0x3c8   : > { %v1544_v48 = vadd.f32 %v1543_v49, %v3728_v31  ;;  %v1706_v23 = vpop.f32.mrf.mxu3  ;;  %v1790_v30 = vsel %vm299_vm0, %v1768_v62, 0.0 }
 0x3c9   : > { %1830 = vmax.xlane.f32.xlu1 %v1829_v54  ;;  %1791 = vadd.xlane.f32.xlu2 %v1790_v30 }
 0x3ca   : > { %v1737_v21 = vadd.f32 %v1544_v48, %v3196_v63  ;;  %v3765_v63 = vadd.f32 %v1703_v12, %v3743_v42  ;;  %v3778_v12 = vadd.f32 %v3726_v60, %v3743_v42  ;;  %v3793_v60 = vadd.f32 %v1700_v7, %v3743_v42 }
 0x3cc   : > { %v1753_v46 = vsub.f32 %v1737_v21, %v3359_v5  ;;  %v3769_v5 = vadd.f32 %v1688_v28, %v3743_v42  ;;  %v1847_v41 = vsel %vm1173_vm3, %v3765_v63, -inf  ;;  %v3784_v28 = vadd.f32 %v1697_v40, %v3743_v42 }
 0x3cd   : > { %v1835_v48 = vsel %vm1173_vm3, %v3778_v12, -inf  ;;  %v3796_v40 = vadd.f32 %v1706_v23, %v3743_v42 }
 0x3ce   : > { %v1769_v2 = vmul.f32 %v1753_v46, %v1753_v46  ;;  %v1841_v54 = vsel %vm1173_vm3, %v3784_v28, -inf }
 0x3cf   : > { %v1546_v47 = vpop.f32.mrf.mxu2 }
 0x3d0   : > { %v1547_v58 = vadd.f32 %v1546_v47, %v3728_v31  ;;  %v1709_v32 = vpop.f32.mrf.mxu3  ;;  %v1793_v1 = vsel %vm299_vm0, %v1769_v2, 0.0  ;;  %v1844_v47 = vsel %vm1173_vm3, %v3793_v60, -inf }
 0x3d1   : > { %1839 = vmax.xlane.f32.xlu1 %v1838_v56  ;;  %1794 = vadd.xlane.f32.xlu2 %v1793_v1  ;;  %v1850_v56 = vsel %vm1173_vm3, %v3796_v40, -inf  ;;  %v3806_v7 = vadd.f32 %v1709_v32, %v3743_v42 }
 0x3d2   : > { %v1738_v10 = vadd.f32 %v1547_v58, %v3205_v4  ;;  %v1832_v4 = vsel %vm1173_vm3, %v3769_v5, -inf }
 0x3d4   : > { %v1754_v35 = vsub.f32 %v1738_v10, %v3370_v8 }
 0x3d6   : > { %v1770_v51 = vmul.f32 %v1754_v35, %v1754_v35 }
 0x3d7   : > { %v1549_v35 = vpop.f32.mrf.mxu2 }
 0x3d8   : > { %v1712_v59 = vpop.f32.mrf.mxu3  ;;  %v1796_v43 = vsel %vm299_vm0, %v1770_v51, 0.0 }
 0x3d9   : > { %1848 = vmax.xlane.f32.xlu1 %v1847_v41  ;;  %1797 = vadd.xlane.f32.xlu0 %v1796_v43  ;;  %v3781_v8 = vadd.f32 %v1712_v59, %v3743_v42  ;;  %v1853_v59 = vsel %vm1173_vm3, %v3806_v7, -inf }
 0x3da   : > { %1833 = vmax.xlane.f32.xlu2 %v1832_v4  ;;  %v1550_v4 = vadd.f32 %v1549_v35, %v3728_v31 }
 0x3db   : > { %v1856_v49 = vsel %vm1173_vm3, %v3781_v8, -inf }
 0x3e0   : > { %v1715_v62 = vpop.f32.mrf.mxu3 }
 0x3e1   : > { %1857 = vmax.xlane.f32.xlu1 %v1856_v49  ;;  %1836 = vmax.xlane.f32.xlu0 %v1835_v48 }
 0x3e2   : > { %1842 = vmax.xlane.f32.xlu2 %v1841_v54  ;;  %v1739_v54 = vadd.f32 %v1550_v4, %v3214_v9 }
 0x3e4   : > { %v1282_v30 = vpop.f32.mrf.mxu0 }
 0x3e5   : > { %v1304_v21 = vadd.f32 %v1282_v30, %v3454_v57  ;;  %v3809_v57 = vadd.f32 %v1715_v62, %v3743_v42 }
 0x3e7   : > { %v1321_v46 = vadd.f32 %v3653_v6, %v1304_v21  ;;  %v1859_v32 = vsel %vm1173_vm3, %v3809_v57, -inf }
 0x3e8   : > { %v1718_v2 = vpop.f32.mrf.mxu3 }
 0x3e9   : > { %v1337_v58 = vmax.f32 %v1321_v46, 0.0  ;;  %1845 = vmax.xlane.f32.xlu0 %v1844_v47  ;;  %v3825_v62 = vadd.f32 %v1718_v2, %v3743_v42 }
 0x3ea   : > { %1851 = vmax.xlane.f32.xlu2 %v1850_v56 }
 0x3eb   : > { %2784 = vmatmul.msk.f32.gmra.mxu2 %vm550_vm1, %v1337_v58  ;;  %v1862_v46 = vsel %vm1173_vm3, %v3825_v62, -inf }
 0x3ec   : > { %v1285_v23 = vpop.f32.mrf.mxu0 }
 0x3ed   : > { %v1305_v1 = vadd.f32 %v1285_v23, %v3463_v3 }
 0x3ef   : > { %v1322_v10 = vadd.f32 %v3653_v6, %v1305_v1 }
 0x3f0   : > { %v1721_v51 = vpop.f32.mrf.mxu3 }
 0x3f1   : > { %v1338_v41 = vmax.f32 %v1322_v10, 0.0  ;;  %v3816_v43 = vadd.f32 %v1721_v51, %v3743_v42  ;;  %1854 = vmax.xlane.f32.xlu0 %v1853_v59 }
 0x3f2   : > { %1860 = vmax.xlane.f32.xlu2 %v1859_v32 }
 0x3f3   : > { %2785 = vmatmul.msk.f32.gmra.mxu2 %vm550_vm1, %v1338_v41  ;;  %v1865_v3 = vsel %vm1173_vm3, %v3816_v43, -inf }
 0x3f4   : > { %1866 = vmax.xlane.f32.xlu1 %v1865_v3  ;;  %v1288_v49 = vpop.f32.mrf.mxu0 }
 0x3f5   : > { %v1306_v48 = vadd.f32 %v1288_v49, %v3472_v17  ;;  %v1755_v17 = vsub.f32 %v1739_v54, %v3381_v13  ;;  %v3857_v49 = vpop.f32.mrf.mxu2 }
 0x3f7   : > { %v1323_v30 = vadd.f32 %v3653_v6, %v1306_v48  ;;  %v1771_v9 = vmul.f32 %v1755_v17, %v1755_v17 }
 0x3f8   : > { %v1724_v21 = vpop.f32.mrf.mxu3 }
 0x3f9   : > { %v1339_v47 = vmax.f32 %v1323_v30, 0.0  ;;  %v3833_v58 = vadd.f32 %v1724_v21, %v3743_v42  ;;  %1863 = vmax.xlane.f32.xlu0 %v1862_v46  ;;  %v1799_v1 = vsel %vm299_vm0, %v1771_v9, 0.0 }
 0x3fb   : > { %2786 = vmatmul.msk.f32.gmra.mxu2 %vm550_vm1, %v1339_v47  ;;  %v1868_v2 = vsel %vm1173_vm3, %v3833_v58, -inf }
 0x3fc   : > { %1869 = vmax.xlane.f32.xlu2 %v1868_v2 }
 0x400   : > { %v1727_v56 = vpop.f32.mrf.mxu3 }
 0x401   : > { %v3840_v6 = vadd.f32 %v1727_v56, %v3743_v42 }
 0x403   : > { %v1871_v23 = vsel %vm1173_vm3, %v3840_v6, -inf }
 0x404   : > { %1872 = vmax.xlane.f32.xlu0 %v1871_v23  ;;  %1800 = vadd.xlane.f32.xlu2 %v1799_v1 }
 0x408   : > { %v1730_v10 = vpop.f32.mrf.mxu3 }
 0x409   : > { %v3846_v35 = vadd.f32 %v1730_v10, %v3743_v42 }
 0x40b   : > { %v1874_v13 = vsel %vm1173_vm3, %v3846_v35, -inf }
 0x40c   : > { %1875 = vmax.xlane.f32.xlu1 %v1874_v13 }
 0x424   : > { %v3850_v51 = vpop.xlane.xlu2 %1782 }
 0x425   : > { %4742 = vst [vmem:[#allocation19_spill] sm:$0xff] %v3850_v51 }
 0x42c   : > { %v3859_v48 = vpop.xlane.xlu0 %1785 }
 0x42d   : > { %4745 = vst [vmem:[#allocation22_spill] sm:$0xff] %v3859_v48 }
 0x434   : > { %v3852_v59 = vpop.xlane.xlu1 %1788 }
 0x435   : > { %4743 = vst [vmem:[#allocation20_spill] sm:$0xff] %v3852_v59 }
 0x43c   : > { %v1831_v41 = vpop.xlane.xlu1 %1830  ;;  %v3854_v32 = vpop.xlane.xlu2 %1791 }
 0x43d   : > { %4744 = vst [vmem:[#allocation21_spill] sm:$0xff] %v3854_v32  ;;  %v1877_v4 = vsub.f32 %v3747_v24, %v1831_v41  ;;  %v3868_v24 = vpop.f32.mrf.mxu2 }
 0x43f   : > { %v1893_v3 = vmul.f32 1.442695, %v1877_v4 }
 0x441   : > { %2844 = vpow2.f32 %v1893_v3 }
 0x444   : > { %v1840_v42 = vpop.xlane.xlu1 %1839  ;;  %v3861_v54 = vpop.xlane.xlu2 %1794 }
 0x445   : > { %4746 = vst [vmem:[#allocation23_spill] sm:$0xff] %v3861_v54  ;;  %v1880_v30 = vsub.f32 %v3756_v52, %v1840_v42 }
 0x447   : > { %v3864_v21 = vpop.eup %2844  ;;  %v1899_v46 = vmul.f32 1.442695, %v1880_v30  ;;  %v3880_v30 = vpop.f32.mrf.mxu2 }
 0x448   : > { %v1925_v47 = vsel %vm1173_vm3, %v3864_v21, 0.0 }
 0x449   : > { %2846 = vpow2.f32 %v1899_v46  ;;  %1926 = vadd.xlane.f32.xlu0 %v1925_v47 }
 0x44c   : > { %v1849_v2 = vpop.xlane.xlu1 %1848  ;;  %v3870_v17 = vpop.xlane.xlu0 %1797 }
 0x44d   : > { %4747 = vst [vmem:[#allocation24_spill] sm:$0xff] %v3870_v17  ;;  %v1883_v9 = vsub.f32 %v3765_v63, %v1849_v2  ;;  %v1834_v56 = vpop.xlane.xlu2 %1833 }
 0x44e   : > { %v1878_v23 = vsub.f32 %v3769_v5, %v1834_v56 }
 0x44f   : > { %v3874_v1 = vpop.eup %2846  ;;  %v1905_v52 = vmul.f32 1.442695, %v1883_v9 }
 0x450   : > { %v1895_v10 = vmul.f32 1.442695, %v1878_v23  ;;  %v1934_v13 = vsel %vm1173_vm3, %v3874_v1, 0.0 }
 0x451   : > { %2848 = vpow2.f32 %v1905_v52  ;;  %1935 = vadd.xlane.f32.xlu0 %v1934_v13 }
 0x452   : > { %2850 = vpow2.f32 %v1895_v10 }
 0x454   : > { %v1858_v41 = vpop.xlane.xlu1 %1857  ;;  %v1837_v4 = vpop.xlane.xlu0 %1836 }
 0x455   : > { %v1886_v3 = vsub.f32 %v3781_v8, %v1858_v41  ;;  %v1879_v42 = vsub.f32 %v3778_v12, %v1837_v4  ;;  %v1843_v63 = vpop.xlane.xlu2 %1842 }
 0x456   : > { %v1881_v5 = vsub.f32 %v3784_v28, %v1843_v63 }
 0x457   : > { %v3883_v46 = vpop.eup %2848  ;;  %v1911_v47 = vmul.f32 1.442695, %v1886_v3  ;;  %v1897_v2 = vmul.f32 1.442695, %v1879_v42  ;;  %v1561_v3 = vpop.f32.mrf.mxu2 }
 0x458   : > { %v3885_v9 = vpop.eup %2850  ;;  %v1901_v56 = vmul.f32 1.442695, %v1881_v5  ;;  %v1943_v23 = vsel %vm1173_vm3, %v3883_v46, 0.0 }
 0x459   : > { %2852 = vpow2.f32 %v1911_v47  ;;  %1944 = vadd.xlane.f32.xlu0 %v1943_v23  ;;  %v1928_v12 = vsel %vm1173_vm3, %v3885_v9, 0.0 }
 0x45a   : > { %2854 = vpow2.f32 %v1897_v2  ;;  %1929 = vadd.xlane.f32.xlu1 %v1928_v12 }
 0x45b   : > { %2856 = vpow2.f32 %v1901_v56 }
 0x45c   : > { %v1846_v8 = vpop.xlane.xlu0 %1845 }
 0x45d   : > { %v1882_v28 = vsub.f32 %v3793_v60, %v1846_v8  ;;  %v1852_v52 = vpop.xlane.xlu2 %1851 }
 0x45e   : > { %v1884_v10 = vsub.f32 %v3796_v40, %v1852_v52 }
 0x45f   : > { %v3893_v13 = vpop.eup %2852  ;;  %v1903_v41 = vmul.f32 1.442695, %v1882_v28 }
 0x460   : > { %v3895_v4 = vpop.eup %2854  ;;  %v1907_v42 = vmul.f32 1.442695, %v1884_v10  ;;  %v1952_v63 = vsel %vm1173_vm3, %v3893_v13, 0.0 }
 0x461   : > { %v3899_v5 = vpop.eup %2856  ;;  %2858 = vpow2.f32 %v1903_v41  ;;  %1953 = vadd.xlane.f32.xlu0 %v1952_v63  ;;  %v1931_v60 = vsel %vm1173_vm3, %v3895_v4, 0.0 }
 0x462   : > { %2860 = vpow2.f32 %v1907_v42  ;;  %1932 = vadd.xlane.f32.xlu2 %v1931_v60  ;;  %v1937_v40 = vsel %vm1173_vm3, %v3899_v5, 0.0 }
 0x463   : > { %1938 = vadd.xlane.f32.xlu1 %v1937_v40 }
 0x464   : > { %v1855_v47 = vpop.xlane.xlu0 %1854 }
 0x465   : > { %v1885_v2 = vsub.f32 %v3806_v7, %v1855_v47  ;;  %v1861_v56 = vpop.xlane.xlu2 %1860  ;;  %v1564_v7 = vpop.f32.mrf.mxu2 }
 0x466   : > { %v1887_v23 = vsub.f32 %v3809_v57, %v1861_v56 }
 0x467   : > { %v3907_v12 = vpop.eup %2858  ;;  %v1909_v8 = vmul.f32 1.442695, %v1885_v2  ;;  %v1867_v28 = vpop.xlane.xlu1 %1866 }
 0x468   : > { %v3909_v52 = vpop.eup %2860  ;;  %v1913_v10 = vmul.f32 1.442695, %v1887_v23  ;;  %v1889_v41 = vsub.f32 %v3816_v43, %v1867_v28  ;;  %v1940_v42 = vsel %vm1173_vm3, %v3907_v12, 0.0 }
 0x469   : > { %2862 = vpow2.f32 %v1909_v8  ;;  %v1946_v63 = vsel %vm1173_vm3, %v3909_v52, 0.0 }
 0x46a   : > { %2864 = vpow2.f32 %v1913_v10  ;;  %v1917_v60 = vmul.f32 1.442695, %v1889_v41  ;;  %1941 = vadd.xlane.f32.xlu2 %v1940_v42 }
 0x46b   : > { %1947 = vadd.xlane.f32.xlu1 %v1946_v63 }
 0x46c   : > { %2866 = vpow2.f32 %v1917_v60  ;;  %v1864_v57 = vpop.xlane.xlu0 %1863 }
 0x46d   : > { %v1888_v40 = vsub.f32 %v3825_v62, %v1864_v57  ;;  %v1553_v62 = vadd.f32 %v3857_v49, %v3728_v31  ;;  %v1567_v63 = vpop.f32.mrf.mxu2  ;;  %v1556_v49 = vadd.f32 %v3868_v24, %v3728_v31 }
 0x46f   : > { %v3917_v47 = vpop.eup %2862  ;;  %v1915_v2 = vmul.f32 1.442695, %v1888_v40  ;;  %v1870_v43 = vpop.xlane.xlu2 %1869  ;;  %v1740_v60 = vadd.f32 %v1553_v62, %v3223_v14  ;;  %v1562_v14 = vadd.f32 %v1561_v3, %v3728_v31  ;;  %v1565_v3 = vadd.f32 %v1564_v7, %v3728_v31 }
 0x470   : > { %v3919_v56 = vpop.eup %2864  ;;  %v1890_v23 = vsub.f32 %v3833_v58, %v1870_v43  ;;  %v1949_v8 = vsel %vm1173_vm3, %v3917_v47, 0.0 }
 0x471   : > { %2868 = vpow2.f32 %v1915_v2  ;;  %v1955_v28 = vsel %vm1173_vm3, %v3919_v56, 0.0 }
 0x472   : > { %v3926_v10 = vpop.eup %2866  ;;  %v1919_v41 = vmul.f32 1.442695, %v1890_v23  ;;  %1950 = vadd.xlane.f32.xlu2 %v1949_v8 }
 0x473   : > { %1956 = vadd.xlane.f32.xlu1 %v1955_v28  ;;  %v1961_v42 = vsel %vm1173_vm3, %v3926_v10, 0.0  ;;  %v1756_v28 = vsub.f32 %v1740_v60, %v3392_v19 }
 0x474   : > { %2870 = vpow2.f32 %v1919_v41  ;;  %1962 = vadd.xlane.f32.xlu0 %v1961_v42 }
 0x475   : > { %v1570_v41 = vpop.f32.mrf.mxu2  ;;  %v1772_v42 = vmul.f32 %v1756_v28, %v1756_v28 }
 0x477   : > { %v3932_v58 = vpop.eup %2868  ;;  %v1873_v57 = vpop.xlane.xlu0 %1872 }
 0x478   : > { %v1891_v40 = vsub.f32 %v3840_v6, %v1873_v57  ;;  %v1958_v2 = vsel %vm1173_vm3, %v3932_v58, 0.0  ;;  %v1741_v6 = vadd.f32 %v1556_v49, %v3232_v20  ;;  %v1743_v57 = vadd.f32 %v1562_v14, %v3250_v34 }
 0x479   : > { %v1802_v20 = vsel %vm299_vm0, %v1772_v42, 0.0  ;;  %v1571_v49 = vadd.f32 %v1570_v41, %v3728_v31 }
 0x47a   : > { %v3938_v43 = vpop.eup %2870  ;;  %v1921_v23 = vmul.f32 1.442695, %v1891_v40  ;;  %1959 = vadd.xlane.f32.xlu2 %v1958_v2  ;;  %v1559_v2 = vadd.f32 %v3880_v30, %v3728_v31  ;;  %v1757_v19 = vsub.f32 %v1741_v6, %v3403_v25  ;;  %v1759_v34 = vsub.f32 %v1743_v57, %v3421_v38 }
 0x47b   : > { %v1964_v8 = vsel %vm1173_vm3, %v3938_v43, 0.0  ;;  %v1744_v25 = vadd.f32 %v1565_v3, %v3259_v39  ;;  %v1746_v7 = vadd.f32 %v1571_v49, %v3279_v16 }
 0x47c   : > { %2872 = vpow2.f32 %v1921_v23  ;;  %1965 = vadd.xlane.f32.xlu1 %v1964_v8  ;;  %v1773_v23 = vmul.f32 %v1757_v19, %v1757_v19  ;;  %v1775_v8 = vmul.f32 %v1759_v34, %v1759_v34 }
 0x47d   : > { %v1573_v30 = vpop.f32.mrf.mxu2  ;;  %v1760_v38 = vsub.f32 %v1744_v25, %v3430_v45  ;;  %v1762_v16 = vsub.f32 %v1746_v7, %v3448_v55 }
 0x47e   : > { %v1805_v14 = vsel %vm299_vm0, %v1773_v23, 0.0  ;;  %v1574_v6 = vadd.f32 %v1573_v30, %v3728_v31  ;;  %v1811_v39 = vsel %vm299_vm0, %v1775_v8, 0.0 }
 0x47f   : > { %v1876_v62 = vpop.xlane.xlu1 %1875 }
 0x480   : > { %v1892_v24 = vsub.f32 %v3846_v35, %v1876_v62  ;;  %v1742_v35 = vadd.f32 %v1559_v2, %v3241_v27 }
 0x482   : > { %v3949_v40 = vpop.eup %2872  ;;  %v1923_v17 = vmul.f32 1.442695, %v1892_v24  ;;  %v1758_v41 = vsub.f32 %v1742_v35, %v3412_v33  ;;  %v1747_v33 = vadd.f32 %v1574_v6, %v3289_v22  ;;  %v1778_v24 = vmul.f32 %v1762_v16, %v1762_v16 }
 0x483   : > { %v1967_v60 = vsel %vm1173_vm3, %v3949_v40, 0.0 }
 0x484   : > { %2874 = vpow2.f32 %v1923_v17  ;;  %1968 = vadd.xlane.f32.xlu2 %v1967_v60  ;;  %1803 = vadd.xlane.f32.xlu1 %v1802_v20  ;;  %v1568_v17 = vadd.f32 %v1567_v63, %v3728_v31  ;;  %v1774_v62 = vmul.f32 %v1758_v41, %v1758_v41  ;;  %v1776_v63 = vmul.f32 %v1760_v38, %v1760_v38 }
 0x485   : > { %v1576_v57 = vpop.f32.mrf.mxu2  ;;  %v1763_v60 = vsub.f32 %v1747_v33, %v3457_v0  ;;  %v1820_v55 = vsel %vm299_vm0, %v1778_v24, 0.0  ;;  %v3996_v33 = vpop.xlane.xlu2 %1800 }
 0x486   : > { %v1745_v42 = vadd.f32 %v1568_v17, %v3269_v44  ;;  %v1808_v2 = vsel %vm299_vm0, %v1774_v62, 0.0  ;;  %v1577_v19 = vadd.f32 %v1576_v57, %v3728_v31  ;;  %v1814_v45 = vsel %vm299_vm0, %v1776_v63, 0.0  ;;  %v4749_v44 = vld [vmem:[#allocation5_spill] sm:$0xff]  ;;  %v4750_v31 = vld [vmem:[#allocation6_spill] sm:$0xff] }
 0x487   : > { %v1779_v49 = vmul.f32 %v1763_v60, %v1763_v60  ;;  %4751 = vst [vmem:[#allocation5_spill] sm:$0xff] %v3996_v33  ;;  %v4753_v60 = vld [vmem:[#allocation9_spill] sm:$0xff] }
 0x488   : > { %v1761_v3 = vsub.f32 %v1745_v42, %v3439_v50  ;;  %v1748_v22 = vadd.f32 %v1577_v19, %v4749_v44  ;;  %v4752_v19 = vld [vmem:[#allocation8_spill] sm:$0xff]  ;;  %v4754_v44 = vld [vmem:[#allocation10_spill] sm:$0xff] }
 0x489   : > { %v1823_v35 = vsel %vm299_vm0, %v1779_v49, 0.0 }
 0x48a   : > { %v3963_v28 = vpop.eup %2874  ;;  %v1777_v20 = vmul.f32 %v1761_v3, %v1761_v3  ;;  %v1764_v30 = vsub.f32 %v1748_v22, %v4750_v31  ;;  %v4756_v31 = vld [vmem:[#allocation12_spill] sm:$0xff] }
 0x48b   : > { %4748 = vst [vmem:[#allocation25_spill] sm:$0xff] %v3963_v28  ;;  %v1970_v27 = vsel %vm1173_vm3, %v3963_v28, 0.0 }
 0x48c   : > { %1971 = vadd.xlane.f32.xlu0 %v1970_v27  ;;  %1806 = vadd.xlane.f32.xlu2 %v1805_v14  ;;  %v1817_v34 = vsel %vm299_vm0, %v1777_v20, 0.0  ;;  %v1780_v50 = vmul.f32 %v1764_v30, %v1764_v30  ;;  %v4755_v20 = vld [vmem:[#allocation11_spill] sm:$0xff] }
 0x48d   : > { %1812 = vadd.xlane.f32.xlu1 %v1811_v39 }
 0x48e   : > { %v1826_v0 = vsel %vm299_vm0, %v1780_v50, 0.0 }
 0x494   : > { %1809 = vadd.xlane.f32.xlu0 %v1808_v2  ;;  %1815 = vadd.xlane.f32.xlu2 %v1814_v45 }
 0x495   : > { %1821 = vadd.xlane.f32.xlu1 %v1820_v55 }
 0x49c   : > { %1818 = vadd.xlane.f32.xlu0 %v1817_v34  ;;  %1824 = vadd.xlane.f32.xlu2 %v1823_v35 }
 0x4a4   : > { %1827 = vadd.xlane.f32.xlu0 %v1826_v0  ;;  %v4757_v0 = vld [vmem:[#allocation13_spill] sm:$0xff] }
 0x4bc   : > { %v1927_v23 = vpop.xlane.xlu0 %1926 }
 0x4bd   : > { %2876 = vrcp.f32 %v1927_v23  ;;  %v1984_v41 = vand.u32 2147483648, %v1927_v23  ;;  %v1982_v6 = vand.u32 2147483647, %v1927_v23  ;;  %vm1978_vm7 = vweird.f32 %v1927_v23 }
 0x4bf   : > { %v1985_v39 = vor.u32 1.1754944e-38, %v1984_v41  ;;  %vm1983_vm0 = vcmp.eq.f32.partialorder %v1982_v6, 8.507059e+37 }
 0x4c3   : > { %v2877_v25 = vpop.eup %2876 }
 0x4c4   : > { %v1974_v7 = vmul.f32 %v2877_v25, %v1927_v23  ;;  %v3987_v8 = vpop.xlane.xlu0 %1935  ;;  %vm1979_vm1 = vweird.f32 %v2877_v25 }
 0x4c5   : > { %2878 = vrcp.f32 %v3987_v8  ;;  %vm1980_vm8 = vmor %vm1978_vm7, %vm1979_vm1  ;;  %vm2020_vm9 = vweird.f32 %v3987_v8 }
 0x4c6   : > { %v1975_v14 = vsub.f32 1.0, %v1974_v7 }
 0x4c8   : > { %v1976_v17 = vmul.f32 %v2877_v25, %v1975_v14 }
 0x4ca   : > { %v1977_v27 = vadd.f32 %v2877_v25, %v1976_v17 }
 0x4cb   : > { %v3990_v38 = vpop.eup %2878 }
 0x4cc   : > { %v1981_v16 = vsel %vm1980_vm8, %v2877_v25, %v1977_v27  ;;  %v2016_v62 = vmul.f32 %v3990_v38, %v3987_v8  ;;  %v3994_v42 = vpop.xlane.xlu0 %1944  ;;  %vm2021_vm10 = vweird.f32 %v3990_v38 }
 0x4cd   : > { %v1986_v63 = vsel %vm1983_vm0, %v1985_v39, %v1981_v16  ;;  %2880 = vrcp.f32 %v3994_v42  ;;  %v3999_v57 = vpop.xlane.xlu1 %1929  ;;  %v2024_v16 = vand.u32 2147483647, %v3987_v8  ;;  %vm4042_vm11 = vmor %vm2020_vm9, %vm2021_vm10  ;;  %vm2062_vm13 = vweird.f32 %v3994_v42 }
 0x4ce   : > { %v2017_v24 = vsub.f32 1.0, %v2016_v62  ;;  %2882 = vrcp.f32 %v3999_v57  ;;  %v2197_v2 = vmul.f32 %v3864_v21, %v1986_v63  ;;  %v4758_v21 = vld [vmem:[#allocation14_spill] sm:$0xff]  ;;  %v2026_v62 = vand.u32 2147483648, %v3987_v8  ;;  %v4761_v8 = vld [vmem:[#allocation16_spill] sm:$0xff] }
 0x4cf   : > { %v1998_v22 = vand.u32 2147483648, %v3999_v57  ;;  %vm2025_vm12 = vcmp.eq.f32.partialorder %v2024_v16, 8.507059e+37  ;;  %vm1992_vm15 = vweird.f32 %v3999_v57 }
 0x4d0   : > { %v2018_v3 = vmul.f32 %v3990_v38, %v2017_v24  ;;  %v2261_v34 = vsub.f32 1.0, %v2197_v2  ;;  %2884 = vlog2.f32 %v2197_v2  ;;  %v2066_v2 = vand.u32 2147483647, %v3994_v42 }
 0x4d1   : > { %v2027_v55 = vor.u32 1.1754944e-38, %v2026_v62 }
 0x4d2   : > { %v2019_v6 = vadd.f32 %v3990_v38, %v2018_v3  ;;  %v2068_v3 = vand.u32 2147483648, %v3994_v42  ;;  %vm4059_vm14 = vcmp.eq.f32.partialorder %v2066_v2, 8.507059e+37 }
 0x4d3   : > { %v4008_v35 = vpop.eup %2880 }
 0x4d4   : > { %v4014_v7 = vpop.eup %2882  ;;  %v2058_v41 = vmul.f32 %v4008_v35, %v3994_v42  ;;  %v4020_v17 = vpop.xlane.xlu0 %1953  ;;  %v2023_v50 = vsel %vm4042_vm11, %v3990_v38, %v2019_v6  ;;  %v2069_v38 = vor.u32 1.1754944e-38, %v2068_v3  ;;  %vm2063_vm2 = vweird.f32 %v4008_v35 }
 0x4d5   : > { %v1988_v27 = vmul.f32 %v4014_v7, %v3999_v57  ;;  %2886 = vrcp.f32 %v4020_v17  ;;  %v4027_v39 = vpop.xlane.xlu2 %1932  ;;  %vm1993_vm5 = vweird.f32 %v4014_v7  ;;  %v2110_v3 = vand.u32 2147483648, %v4020_v17  ;;  %vm4094_vm1 = vmor %vm2062_vm13, %vm2063_vm2 }
 0x4d6   : > { %v2059_v63 = vsub.f32 1.0, %v2058_v41  ;;  %v4031_v24 = vpop.xlane.xlu1 %1938  ;;  %2888 = vlog2.f32 %v2261_v34  ;;  %v1996_v34 = vand.u32 2147483647, %v3999_v57  ;;  %v2885_v30 = vpop.eup %2884  ;;  %vm2104_vm6 = vweird.f32 %v4020_v17  ;;  %vm4109_vm7 = vmor %vm1992_vm15, %vm1993_vm5 }
 0x4d7   : > { %v1989_v14 = vsub.f32 1.0, %v1988_v27  ;;  %2890 = vrcp.f32 %v4031_v24  ;;  %v2038_v33 = vand.u32 2147483647, %v4031_v24  ;;  %v2214_v48 = vmul.f32 0.6931472, %v2885_v30 }
 0x4d8   : > { %v2060_v25 = vmul.f32 %v4008_v35, %v2059_v63  ;;  %2892 = vrcp.f32 %v4027_v39  ;;  %v2028_v63 = vsel %vm2025_vm12, %v2027_v55, %v2023_v50  ;;  %vm4065_vm4 = vcmp.eq.f32.partialorder %v1996_v34, 8.507059e+37 }
 0x4d9   : > { %v1990_v49 = vmul.f32 %v4014_v7, %v1989_v14  ;;  %v1999_v14 = vor.u32 1.1754944e-38, %v1998_v22  ;;  %v2040_v55 = vand.u32 2147483648, %v4031_v24  ;;  %v2108_v22 = vand.u32 2147483647, %v4020_v17 }
 0x4da   : > { %v2061_v2 = vadd.f32 %v4008_v35, %v2060_v25  ;;  %v2012_v15 = vand.u32 2147483648, %v4027_v39  ;;  %vm2034_vm8 = vweird.f32 %v4031_v24  ;;  %vm2006_vm9 = vweird.f32 %v4027_v39 }
 0x4db   : > { %v4056_v45 = vpop.eup %2886  ;;  %v1991_v34 = vadd.f32 %v4014_v7, %v1990_v49  ;;  %vm4120_vm0 = vcmp.eq.f32.partialorder %v2108_v22, 8.507059e+37  ;;  %v2245_v49 = vmax.f32 %v2214_v48, -100.0  ;;  %vm4149_vm12 = vcmp.eq.f32.partialorder %v2038_v33, 8.507059e+37 }
 0x4dc   : > { %v2889_v6 = vpop.eup %2888  ;;  %v2100_v62 = vmul.f32 %v4056_v45, %v4020_v17  ;;  %v2065_v30 = vsel %vm4094_vm1, %v4008_v35, %v2061_v2  ;;  %v2010_v2 = vand.u32 2147483647, %v4027_v39  ;;  %vm2105_vm10 = vweird.f32 %v4056_v45 }
 0x4dd   : > { %v4071_v41 = vpop.eup %2890  ;;  %v4077_v50 = vpop.xlane.xlu2 %1941  ;;  %v2278_v32 = vmul.f32 0.6931472, %v2889_v6  ;;  %v2111_v6 = vor.u32 1.1754944e-38, %v2110_v3  ;;  %v4127_v3 = vmul.f32 %v3874_v1, %v2028_v63  ;;  %v2013_v22 = vor.u32 1.1754944e-38, %v2012_v15  ;;  %vm4170_vm15 = vmor %vm2104_vm6, %vm2105_vm10 }
 0x4de   : > { %v2101_v23 = vsub.f32 1.0, %v2100_v62  ;;  %v2030_v59 = vmul.f32 %v4071_v41, %v4031_v24  ;;  %v4084_v54 = vpop.xlane.xlu1 %1947  ;;  %v4086_v25 = vpop.eup %2892  ;;  %vm2035_vm11 = vweird.f32 %v4071_v41 }
 0x4df   : > { %2894 = vrcp.f32 %v4084_v54  ;;  %v2002_v37 = vmul.f32 %v4086_v25, %v4027_v39  ;;  %v2309_v53 = vmax.f32 %v2278_v32, -100.0  ;;  %v4772_v32 = vsub.f32 1.0, %v4752_v19  ;;  %vm4192_vm5 = vmor %vm2034_vm8, %vm2035_vm11 }
 0x4e0   : > { %v2102_v62 = vmul.f32 %v4056_v45, %v2101_v23  ;;  %v2031_v51 = vsub.f32 1.0, %v2030_v59  ;;  %v4114_v59 = vor.u32 1.1754944e-38, %v2040_v55  ;;  %2896 = vrcp.f32 %v4077_v50 }
 0x4e1   : > { %v1995_v23 = vsel %vm4109_vm7, %v4014_v7, %v1991_v34  ;;  %v2003_v57 = vsub.f32 1.0, %v2002_v37  ;;  %v4133_v7 = vsel %vm4059_vm14, %v2069_v38, %v2065_v30  ;;  %v2357_v48 = vmul.f32 %v4772_v32, %v2309_v53 }
 0x4e2   : > { %v2032_v55 = vmul.f32 %v4071_v41, %v2031_v51  ;;  %v2103_v34 = vadd.f32 %v4056_v45, %v2102_v62  ;;  %v4141_v1 = vsel %vm4065_vm4, %v1999_v14, %v1995_v23  ;;  %v2082_v51 = vand.u32 2147483648, %v4084_v54 }
 0x4e3   : > { %v2004_v37 = vmul.f32 %v4086_v25, %v2003_v57  ;;  %vm2007_vm13 = vweird.f32 %v4086_v25  ;;  %vm4154_vm14 = vcmp.eq.f32.partialorder %v2010_v2, 8.507059e+37  ;;  %v2080_v16 = vand.u32 2147483647, %v4084_v54 }
 0x4e4   : > { %2898 = vlog2.f32 %v4127_v3  ;;  %v2033_v62 = vadd.f32 %v4071_v41, %v2032_v55  ;;  %v2052_v30 = vand.u32 2147483647, %v4077_v50  ;;  %v2325_v23 = vmul.f32 %v4752_v19, %v2245_v49  ;;  %vm4210_vm6 = vmor %vm2006_vm9, %vm2007_vm13 }
 0x4e5   : > { %v4137_v42 = vpop.eup %2894  ;;  %v4147_v27 = vpop.xlane.xlu2 %1950  ;;  %v2107_v57 = vsel %vm4170_vm15, %v4056_v45, %v2103_v34  ;;  %v2005_v2 = vadd.f32 %v4086_v25, %v2004_v37  ;;  %vm2076_vm2 = vweird.f32 %v4084_v54  ;;  %v2083_v28 = vor.u32 1.1754944e-38, %v2082_v51 }
 0x4e6   : > { %v2072_v63 = vmul.f32 %v4137_v42, %v4084_v54  ;;  %v4161_v14 = vpop.xlane.xlu1 %1956  ;;  %v4164_v53 = vpop.eup %2896  ;;  %vm2048_vm4 = vweird.f32 %v4077_v50  ;;  %v2373_v55 = vadd.f32 %v2357_v48, %v2325_v23  ;;  %v2054_v34 = vand.u32 2147483648, %v4077_v50 }
 0x4e7   : > { %2900 = vrcp.f32 %v4161_v14  ;;  %v2044_v17 = vmul.f32 %v4164_v53, %v4077_v50  ;;  %v4186_v18 = vpop.xlane.xlu0 %1962  ;;  %v4201_v37 = vsel %vm4120_vm0, %v2111_v6, %v2107_v57  ;;  %v2037_v51 = vsel %vm4192_vm5, %v4071_v41, %v2033_v62 }
 0x4e8   : > { %v2073_v32 = vsub.f32 1.0, %v2072_v63  ;;  %2902 = vrcp.f32 %v4147_v27  ;;  %vm4214_vm1 = vcmp.eq.f32.partialorder %v2080_v16, 8.507059e+37  ;;  %v2389_v63 = vsub.f32 0.0, %v2373_v55 }
 0x4e9   : > { %v2045_v49 = vsub.f32 1.0, %v2044_v17  ;;  %v2264_v6 = vsub.f32 1.0, %v4127_v3  ;;  %v2009_v41 = vsel %vm4210_vm6, %v4086_v25, %v2005_v2  ;;  %vm4223_vm7 = vcmp.eq.f32.partialorder %v2052_v30, 8.507059e+37 }
 0x4ea   : > { %v2074_v45 = vmul.f32 %v4137_v42, %v2073_v32  ;;  %v2899_v35 = vpop.eup %2898  ;;  %v2124_v62 = vand.u32 2147483648, %v4161_v14  ;;  %2904 = vrcp.f32 %v4186_v18  ;;  %vm2077_vm8 = vweird.f32 %v4137_v42 }
 0x4eb   : > { %v2046_v33 = vmul.f32 %v4164_v53, %v2045_v49  ;;  %v2405_v3 = vsel %vm1173_vm3, %v2389_v63, 0.0  ;;  %v2096_v25 = vand.u32 2147483648, %v4147_v27  ;;  %vm2049_vm0 = vweird.f32 %v4164_v53  ;;  %vm4256_vm10 = vmor %vm2076_vm2, %vm2077_vm8 }
 0x4ec   : > { %v2075_v23 = vadd.f32 %v4137_v42, %v2074_v45  ;;  %v2055_v30 = vor.u32 1.1754944e-38, %v2054_v34  ;;  %2406 = vadd.xlane.f32.xlu1 %v2405_v3  ;;  %v4242_v32 = vsel %vm4149_vm12, %v4114_v59, %v2037_v51  ;;  %v4246_v17 = vsel %vm4154_vm14, %v2013_v22, %v2009_v41  ;;  %vm4269_vm11 = vmor %vm2048_vm4, %vm2049_vm0 }
 0x4ed   : > { %v4229_v16 = vpop.eup %2900  ;;  %v2047_v57 = vadd.f32 %v4164_v53, %v2046_v33  ;;  %vm2118_vm9 = vweird.f32 %v4161_v14  ;;  %v2122_v55 = vand.u32 2147483647, %v4161_v14  ;;  %v4250_v19 = vpop.xlane.xlu2 %1959  ;;  %v4260_v38 = vor.u32 1.1754944e-38, %v2124_v62 }
 0x4ee   : > { %v2114_v2 = vmul.f32 %v4229_v16, %v4161_v14  ;;  %v4252_v45 = vpop.eup %2902  ;;  %v2220_v15 = vmul.f32 0.6931472, %v2899_v35  ;;  %2906 = vlog2.f32 %v2264_v6  ;;  %v2079_v22 = vsel %vm4256_vm10, %v4137_v42, %v2075_v23 }
 0x4ef   : > { %v2086_v54 = vmul.f32 %v4252_v45, %v4147_v27  ;;  %vm2090_vm12 = vweird.f32 %v4147_v27  ;;  %v2094_v51 = vand.u32 2147483647, %v4147_v27  ;;  %v4277_v24 = vor.u32 1.1754944e-38, %v2096_v25  ;;  %v4279_v63 = vpop.xlane.xlu1 %1965 }
 0x4f0   : > { %v2115_v59 = vsub.f32 1.0, %v2114_v2  ;;  %v4281_v42 = vpop.eup %2904  ;;  %v2051_v50 = vsel %vm4269_vm11, %v4164_v53, %v2047_v57  ;;  %vm2146_vm13 = vweird.f32 %v4186_v18  ;;  %v2152_v35 = vand.u32 2147483648, %v4186_v18 }
 0x4f1   : > { %2908 = vrcp.f32 %v4250_v19  ;;  %vm2119_vm14 = vweird.f32 %v4229_v16  ;;  %v2087_v41 = vsub.f32 1.0, %v2086_v54  ;;  %v2142_v33 = vmul.f32 %v4281_v42, %v4186_v18 }
 0x4f2   : > { %v2116_v6 = vmul.f32 %v4229_v16, %v2115_v59  ;;  %v2150_v62 = vand.u32 2147483647, %v4186_v18  ;;  %v4296_v23 = vsel %vm4214_vm1, %v2083_v28, %v2079_v22  ;;  %v2248_v53 = vmax.f32 %v2220_v15, -100.0 }
 0x4f3   : > { %v2138_v3 = vand.u32 2147483648, %v4250_v19  ;;  %2910 = vrcp.f32 %v4279_v63  ;;  %v4302_v25 = vsel %vm4223_vm7, %v2055_v30, %v2051_v50  ;;  %vm4305_vm15 = vcmp.eq.f32.partialorder %v2122_v55, 8.507059e+37  ;;  %vm4332_vm7 = vmor %vm2118_vm9, %vm2119_vm14 }
 0x4f4   : > { %v2117_v57 = vadd.f32 %v4229_v16, %v2116_v6  ;;  %v2088_v49 = vmul.f32 %v4252_v45, %v2087_v41  ;;  %v2143_v48 = vsub.f32 1.0, %v2142_v33  ;;  %v2907_v28 = vpop.eup %2906  ;;  %vm2091_vm2 = vweird.f32 %v4252_v45 }
 0x4f5   : > { %v2153_v59 = vor.u32 1.1754944e-38, %v2152_v35  ;;  %v2136_v15 = vand.u32 2147483647, %v4250_v19  ;;  %v2198_v39 = vmul.f32 %v3885_v9, %v4141_v1  ;;  %vm4315_vm4 = vcmp.eq.f32.partialorder %v2094_v51, 8.507059e+37  ;;  %vm4351_vm8 = vmor %vm2090_vm12, %vm2091_vm2 }
 0x4f6   : > { %v2089_v30 = vadd.f32 %v4252_v45, %v2088_v49  ;;  %v2144_v55 = vmul.f32 %v4281_v42, %v2143_v48  ;;  %vm2147_vm5 = vweird.f32 %v4281_v42  ;;  %vm4321_vm6 = vcmp.eq.f32.partialorder %v2150_v62, 8.507059e+37 }
 0x4f7   : > { %v2284_v54 = vmul.f32 0.6931472, %v2907_v28  ;;  %vm2132_vm1 = vweird.f32 %v4250_v19  ;;  %v4326_v50 = vpop.eup %2908  ;;  %v2328_v1 = vmul.f32 %v4755_v20, %v2248_v53  ;;  %v4337_v51 = vor.u32 1.1754944e-38, %v2138_v3  ;;  %v4359_v49 = vpop.xlane.xlu2 %1968  ;;  %vm4368_vm0 = vmor %vm2146_vm13, %vm2147_vm5 }
 0x4f8   : > { %2912 = vlog2.f32 %v2198_v39  ;;  %v2262_v6 = vsub.f32 1.0, %v2198_v39  ;;  %v2121_v35 = vsel %vm4332_vm7, %v4229_v16, %v2117_v57  ;;  %v2145_v41 = vadd.f32 %v4281_v42, %v2144_v55 }
 0x4f9   : > { %v2312_v33 = vmax.f32 %v2284_v54, -100.0  ;;  %v2128_v14 = vmul.f32 %v4326_v50, %v4250_v19  ;;  %v4345_v62 = vpop.eup %2910  ;;  %v2164_v3 = vand.u32 2147483647, %v4279_v63  ;;  %v2166_v16 = vand.u32 2147483648, %v4279_v63 }
 0x4fa   : > { %2914 = vlog2.f32 %v2262_v6  ;;  %v2203_v57 = vmul.f32 %v3883_v46, %v4133_v7  ;;  %v2093_v48 = vsel %vm4351_vm8, %v4252_v45, %v2089_v30  ;;  %v4803_v28 = vsub.f32 1.0, %v4755_v20 }
 0x4fb   : > { %v2129_v55 = vsub.f32 1.0, %v2128_v14  ;;  %vm4374_vm9 = vcmp.eq.f32.partialorder %v2136_v15, 8.507059e+37  ;;  %v2156_v7 = vmul.f32 %v4345_v62, %v4279_v63  ;;  %v2149_v45 = vsel %vm4368_vm0, %v4281_v42, %v2145_v41 }
 0x4fc   : > { %v2360_v39 = vmul.f32 %v4803_v28, %v2312_v33  ;;  %vm2133_vm10 = vweird.f32 %v4326_v50  ;;  %2916 = vlog2.f32 %v2203_v57  ;;  %v2267_v18 = vsub.f32 1.0, %v2203_v57 }
 0x4fd   : > { %v2130_v20 = vmul.f32 %v4326_v50, %v2129_v55  ;;  %v2157_v54 = vsub.f32 1.0, %v2156_v7  ;;  %vm2160_vm11 = vweird.f32 %v4279_v63  ;;  %2918 = vrcp.f32 %v4359_v49  ;;  %vm4410_vm12 = vmor %vm2132_vm1, %vm2133_vm10 }
 0x4fe   : > { %v2376_v30 = vadd.f32 %v2360_v39, %v2328_v1  ;;  %v2913_v15 = vpop.eup %2912  ;;  %v4390_v9 = vsel %vm4305_vm15, %v4260_v38, %v2121_v35  ;;  %v4392_v6 = vor.u32 1.1754944e-38, %v2166_v16  ;;  %2920 = vlog2.f32 %v2267_v18 }
 0x4ff   : > { %v2180_v42 = vand.u32 2147483648, %v4359_v49  ;;  %v2131_v1 = vadd.f32 %v4326_v50, %v2130_v20  ;;  %v2158_v33 = vmul.f32 %v4345_v62, %v2157_v54  ;;  %v2216_v14 = vmul.f32 0.6931472, %v2913_v15  ;;  %v4434_v28 = vpop.xlane.xlu0 %1971 }
 0x500   : > { %v2392_v41 = vsub.f32 0.0, %v2376_v30  ;;  %v2915_v53 = vpop.eup %2914  ;;  %v4400_v57 = vsel %vm4315_vm4, %v4277_v24, %v2093_v48  ;;  %v4404_v38 = vsel %vm4321_vm6, %v2153_v59, %v2149_v45  ;;  %v2201_v35 = vmul.f32 %v3899_v5, %v4242_v32 }
 0x501   : > { %v2206_v22 = vmul.f32 %v3893_v13, %v4201_v37  ;;  %v2135_v59 = vsel %vm4410_vm12, %v4326_v50, %v2131_v1  ;;  %vm2161_vm13 = vweird.f32 %v4345_v62  ;;  %v2246_v34 = vmax.f32 %v2216_v14, -100.0 }
 0x502   : > { %v2414_v24 = vsel %vm1173_vm3, %v2392_v41, 0.0  ;;  %v2917_v19 = vpop.eup %2916  ;;  %vm4423_vm14 = vcmp.eq.f32.partialorder %v2164_v3, 8.507059e+37  ;;  %v2280_v48 = vmul.f32 0.6931472, %v2915_v53  ;;  %v2178_v5 = vand.u32 2147483647, %v4359_v49  ;;  %vm4448_vm2 = vmor %vm2160_vm11, %vm2161_vm13 }
 0x503   : > { %2415 = vadd.xlane.f32.xlu1 %v2414_v24  ;;  %2922 = vlog2.f32 %v2201_v35  ;;  %v2265_v13 = vsub.f32 1.0, %v2201_v35  ;;  %v4428_v37 = vpop.eup %2918  ;;  %v2159_v32 = vadd.f32 %v4345_v62, %v2158_v33  ;;  %v2226_v27 = vmul.f32 0.6931472, %v2917_v19 }
 0x504   : > { %vm2174_vm15 = vweird.f32 %v4359_v49  ;;  %v4432_v50 = vor.u32 1.1754944e-38, %v2180_v42  ;;  %2924 = vlog2.f32 %v2206_v22  ;;  %v2921_v3 = vpop.eup %2920  ;;  %v4439_v39 = vsel %vm4374_vm9, %v4337_v51, %v2135_v59 }
 0x505   : > { %v2310_v55 = vmax.f32 %v2280_v48, -100.0  ;;  %v2326_v7 = vmul.f32 %v4753_v60, %v2246_v34  ;;  %v2170_v45 = vmul.f32 %v4428_v37, %v4359_v49  ;;  %v2251_v18 = vmax.f32 %v2226_v27, -100.0 }
 0x506   : > { %v2290_v30 = vmul.f32 0.6931472, %v2921_v3  ;;  %2926 = vlog2.f32 %v2265_v13  ;;  %v2270_v20 = vsub.f32 1.0, %v2206_v22  ;;  %v4812_v51 = vsub.f32 1.0, %v4753_v60 }
 0x507   : > { %v2171_v15 = vsub.f32 1.0, %v2170_v45  ;;  %v2199_v42 = vmul.f32 %v3895_v4, %v4246_v17  ;;  %2928 = vrcp.f32 %v4434_v28  ;;  %v2163_v41 = vsel %vm4448_vm2, %v4345_v62, %v2159_v32 }
 0x508   : > { %v2358_v46 = vmul.f32 %v4812_v51, %v2310_v55  ;;  %v2315_v1 = vmax.f32 %v2290_v30, -100.0  ;;  %vm2175_vm4 = vweird.f32 %v4428_v37  ;;  %2930 = vlog2.f32 %v2270_v20 }
 0x509   : > { %v2923_v63 = vpop.eup %2922  ;;  %v2172_v14 = vmul.f32 %v4428_v37, %v2171_v15  ;;  %2932 = vlog2.f32 %v2199_v42  ;;  %v2263_v60 = vsub.f32 1.0, %v2199_v42  ;;  %v2331_v2 = vmul.f32 %v4757_v0, %v2251_v18  ;;  %vm4484_vm6 = vmor %vm2174_vm15, %vm2175_vm4 }
 0x50a   : > { %v2374_v33 = vadd.f32 %v2358_v46, %v2326_v7  ;;  %v2925_v53 = vpop.eup %2924  ;;  %v4813_v4 = vsub.f32 1.0, %v4757_v0  ;;  %v2222_v35 = vmul.f32 0.6931472, %v2923_v63  ;;  %v2194_v22 = vand.u32 2147483648, %v4434_v28 }
 0x50b   : > { %v2173_v24 = vadd.f32 %v4428_v37, %v2172_v14  ;;  %vm4467_vm5 = vcmp.eq.f32.partialorder %v2178_v5, 8.507059e+37  ;;  %v2232_v34 = vmul.f32 0.6931472, %v2925_v53  ;;  %2934 = vlog2.f32 %v2263_v60 }
 0x50c   : > { %v2363_v17 = vmul.f32 %v4813_v4, %v2315_v1  ;;  %v2390_v62 = vsub.f32 0.0, %v2374_v33  ;;  %v2927_v19 = vpop.eup %2926  ;;  %v4474_v48 = vsel %vm4423_vm14, %v4392_v6, %v2163_v41  ;;  %v2249_v13 = vmax.f32 %v2222_v35, -100.0 }
 0x50d   : > { %v2192_v32 = vand.u32 2147483647, %v4434_v28  ;;  %v4477_v27 = vpop.eup %2928  ;;  %v2286_v55 = vmul.f32 0.6931472, %v2927_v19  ;;  %v2254_v16 = vmax.f32 %v2232_v34, -100.0  ;;  %vm2188_vm1 = vweird.f32 %v4434_v28 }
 0x50e   : > { %v2379_v0 = vadd.f32 %v2363_v17, %v2331_v2  ;;  %v2408_v3 = vsel %vm1173_vm3, %v2390_v62, 0.0  ;;  %v4489_v6 = vor.u32 1.1754944e-38, %v2194_v22  ;;  %v2931_v7 = vpop.eup %2930  ;;  %v2177_v18 = vsel %vm4484_vm6, %v4428_v37, %v2173_v24 }
 0x50f   : > { %2409 = vadd.xlane.f32.xlu2 %v2408_v3  ;;  %v2329_v30 = vmul.f32 %v4756_v31, %v2249_v13  ;;  %v2184_v49 = vmul.f32 %v4477_v27, %v4434_v28  ;;  %v2933_v20 = vpop.eup %2932  ;;  %v2313_v54 = vmax.f32 %v2286_v55, -100.0  ;;  %v2296_v51 = vmul.f32 0.6931472, %v2931_v7 }
 0x510   : > { %v2395_v45 = vsub.f32 0.0, %v2379_v0  ;;  %v2334_v46 = vmul.f32 %v3618_v26, %v2254_v16  ;;  %vm2189_vm7 = vweird.f32 %v4477_v27  ;;  %v2218_v42 = vmul.f32 0.6931472, %v2933_v20 }
 0x511   : > { %v2185_v41 = vsub.f32 1.0, %v2184_v49  ;;  %v2204_v1 = vmul.f32 %v3909_v52, %v4296_v23  ;;  %v2935_v37 = vpop.eup %2934  ;;  %v4818_v63 = vsub.f32 1.0, %v4756_v31  ;;  %v2318_v14 = vmax.f32 %v2296_v51, -100.0  ;;  %vm4524_vm8 = vmor %vm2188_vm1, %vm2189_vm7 }
 0x512   : > { %v2423_v15 = vsel %vm1173_vm3, %v2395_v45, 0.0  ;;  %v2202_v60 = vmul.f32 %v3907_v12, %v4302_v25  ;;  %v2207_v53 = vmul.f32 %v3919_v56, %v4390_v9  ;;  %v2247_v2 = vmax.f32 %v2218_v42, -100.0 }
 0x513   : > { %2424 = vadd.xlane.f32.xlu1 %v2423_v15  ;;  %v2361_v33 = vmul.f32 %v4818_v63, %v2313_v54  ;;  %v2282_v4 = vmul.f32 0.6931472, %v2935_v37  ;;  %v2186_v17 = vmul.f32 %v4477_v27, %v2185_v41  ;;  %2936 = vlog2.f32 %v2204_v1 }
 0x514   : > { %v4819_v52 = vsub.f32 1.0, %v3618_v26  ;;  %v2268_v22 = vsub.f32 1.0, %v2204_v1  ;;  %2938 = vlog2.f32 %v2202_v60  ;;  %v2182_v31 = vsel %vm4467_vm5, %v4432_v50, %v2177_v18 }
 0x515   : > { %v2377_v35 = vadd.f32 %v2361_v33, %v2329_v30  ;;  %v2311_v62 = vmax.f32 %v2282_v4, -100.0  ;;  %v4515_v12 = vadd.f32 %v4477_v27, %v2186_v17  ;;  %v2266_v56 = vsub.f32 1.0, %v2202_v60 }
 0x516   : > { %v2366_v23 = vmul.f32 %v4819_v52, %v2318_v14  ;;  %2940 = vlog2.f32 %v2268_v22  ;;  %v2271_v24 = vsub.f32 1.0, %v2207_v53  ;;  %v2327_v34 = vmul.f32 %v4754_v44, %v2247_v2 }
 0x517   : > { %v2393_v25 = vsub.f32 0.0, %v2377_v35  ;;  %v4820_v26 = vsub.f32 1.0, %v4754_v44  ;;  %2942 = vlog2.f32 %v2266_v56  ;;  %v2205_v59 = vmul.f32 %v3917_v47, %v4400_v57 }
 0x518   : > { %v2382_v9 = vadd.f32 %v2366_v23, %v2334_v46  ;;  %v2191_v44 = vsel %vm4524_vm8, %v4477_v27, %v4515_v12  ;;  %2944 = vlog2.f32 %v2207_v53  ;;  %v2209_v16 = vmul.f32 %v3926_v10, %v4404_v38 }
 0x519   : > { %v2359_v19 = vmul.f32 %v4820_v26, %v2311_v62  ;;  %v2417_v0 = vsel %vm1173_vm3, %v2393_v25, 0.0  ;;  %v2937_v3 = vpop.eup %2936  ;;  %2946 = vlog2.f32 %v2271_v24  ;;  %v2269_v55 = vsub.f32 1.0, %v2205_v59 }
 0x51a   : > { %v2398_v13 = vsub.f32 0.0, %v2382_v9  ;;  %2418 = vadd.xlane.f32.xlu2 %v2417_v0  ;;  %v2939_v7 = vpop.eup %2938  ;;  %v2228_v57 = vmul.f32 0.6931472, %v2937_v3  ;;  %2948 = vlog2.f32 %v2205_v59  ;;  %v2208_v45 = vmul.f32 %v3932_v58, %v4439_v39 }
 0x51b   : > { %v2375_v5 = vadd.f32 %v2359_v19, %v2327_v34  ;;  %v2224_v30 = vmul.f32 0.6931472, %v2939_v7  ;;  %2950 = vlog2.f32 %v2269_v55  ;;  %v2273_v49 = vsub.f32 1.0, %v2209_v16 }
 0x51c   : > { %v2432_v47 = vsel %vm1173_vm3, %v2398_v13, 0.0  ;;  %v2941_v20 = vpop.eup %2940  ;;  %v2252_v54 = vmax.f32 %v2228_v57, -100.0  ;;  %2952 = vlog2.f32 %v2209_v16  ;;  %v2272_v51 = vsub.f32 1.0, %v2208_v45 }
 0x51d   : > { %2433 = vadd.xlane.f32.xlu1 %v2432_v47  ;;  %v2391_v18 = vsub.f32 0.0, %v2375_v5  ;;  %v2210_v10 = vmul.f32 %v3938_v43, %v4474_v48  ;;  %v2943_v38 = vpop.eup %2942  ;;  %v2292_v15 = vmul.f32 0.6931472, %v2941_v20  ;;  %v2250_v42 = vmax.f32 %v2224_v30, -100.0 }
 0x51e   : > { %2954 = vlog2.f32 %v2273_v49  ;;  %v2945_v41 = vpop.eup %2944  ;;  %v2332_v58 = vmul.f32 %v4758_v21, %v2252_v54  ;;  %v2288_v39 = vmul.f32 0.6931472, %v2943_v38  ;;  %vm4547_vm0 = vcmp.eq.f32.partialorder %v2192_v32, 8.507059e+37 }
 0x51f   : > { %v2411_v46 = vsel %vm1173_vm3, %v2391_v18, 0.0  ;;  %2956 = vlog2.f32 %v2208_v45  ;;  %v2274_v1 = vsub.f32 1.0, %v2210_v10  ;;  %v2947_v37 = vpop.eup %2946  ;;  %v2316_v63 = vmax.f32 %v2292_v15, -100.0 }
 0x520   : > { %2412 = vadd.xlane.f32.xlu0 %v2411_v46  ;;  %v2330_v33 = vmul.f32 %v3574_v11, %v2250_v42  ;;  %v2234_v14 = vmul.f32 0.6931472, %v2945_v41  ;;  %2958 = vlog2.f32 %v2272_v51  ;;  %v2949_v43 = vpop.eup %2948  ;;  %v2314_v60 = vmax.f32 %v2288_v39, -100.0 }
 0x521   : > { %v2298_v53 = vmul.f32 0.6931472, %v2947_v37  ;;  %2960 = vlog2.f32 %v2210_v10  ;;  %v2211_v2 = vmul.f32 %v3949_v40, %v2182_v31  ;;  %v2951_v4 = vpop.eup %2950  ;;  %v4825_v17 = vsub.f32 1.0, %v4758_v21 }
 0x522   : > { %v2255_v52 = vmax.f32 %v2234_v14, -100.0  ;;  %v2230_v23 = vmul.f32 0.6931472, %v2949_v43  ;;  %2962 = vlog2.f32 %v2274_v1  ;;  %v2953_v22 = vpop.eup %2952  ;;  %v4826_v62 = vsub.f32 1.0, %v3574_v11 }
 0x523   : > { %v2364_v35 = vmul.f32 %v4825_v17, %v2316_v63  ;;  %v2319_v32 = vmax.f32 %v2298_v53, -100.0  ;;  %v2294_v56 = vmul.f32 0.6931472, %v2951_v4  ;;  %2964 = vlog2.f32 %v2211_v2 }
 0x524   : > { %v2362_v28 = vmul.f32 %v4826_v62, %v2314_v60  ;;  %v2955_v25 = vpop.eup %2954  ;;  %v2335_v24 = vmul.f32 %v3628_v29, %v2255_v52  ;;  %v2253_v34 = vmax.f32 %v2230_v23, -100.0  ;;  %v2238_v40 = vmul.f32 0.6931472, %v2953_v22 }
 0x525   : > { %v2380_v9 = vadd.f32 %v2364_v35, %v2332_v58  ;;  %v2957_v31 = vpop.eup %2956  ;;  %v4827_v21 = vsub.f32 1.0, %v3628_v29  ;;  %v2317_v59 = vmax.f32 %v2294_v56, -100.0  ;;  %v2302_v0 = vmul.f32 0.6931472, %v2955_v25 }
 0x526   : > { %v2378_v26 = vadd.f32 %v2362_v28, %v2330_v33  ;;  %v2959_v13 = vpop.eup %2958  ;;  %v2333_v11 = vmul.f32 %v3608_v61, %v2253_v34  ;;  %v2257_v5 = vmax.f32 %v2238_v40, -100.0  ;;  %v2236_v55 = vmul.f32 0.6931472, %v2957_v31  ;;  %v4830_v33 = vld [vmem:[#allocation15_spill] sm:$0xff]  ;;  %v4833_v40 = vld [vmem:[#allocation17_spill] sm:$0xff] }
 0x527   : > { %v2367_v19 = vmul.f32 %v4827_v21, %v2319_v32  ;;  %v2396_v3 = vsub.f32 0.0, %v2380_v9  ;;  %v2961_v16 = vpop.eup %2960  ;;  %v4828_v57 = vsub.f32 1.0, %v3608_v61  ;;  %v2321_v18 = vmax.f32 %v2302_v0, -100.0 }
 0x528   : > { %v2394_v7 = vsub.f32 0.0, %v2378_v26  ;;  %v2963_v30 = vpop.eup %2962  ;;  %v2337_v29 = vmul.f32 %v4761_v8, %v2257_v5  ;;  %v2256_v20 = vmax.f32 %v2236_v55, -100.0  ;;  %v2300_v54 = vmul.f32 0.6931472, %v2959_v13 }
 0x529   : > { %v2383_v47 = vadd.f32 %v2367_v19, %v2335_v24  ;;  %v2365_v45 = vmul.f32 %v4828_v57, %v2317_v59  ;;  %v2426_v49 = vsel %vm1173_vm3, %v2396_v3, 0.0  ;;  %v2965_v51 = vpop.eup %2964  ;;  %v4829_v15 = vsub.f32 1.0, %v4761_v8  ;;  %v4834_v3 = vld [vmem:[#allocation18_spill] sm:$0xff] }
 0x52a   : > { %2427 = vadd.xlane.f32.xlu2 %v2426_v49  ;;  %v2420_v10 = vsel %vm1173_vm3, %v2394_v7, 0.0  ;;  %v2196_v61 = vsel %vm4547_vm0, %v4489_v6, %v2191_v44  ;;  %v2320_v41 = vmax.f32 %v2300_v54, -100.0  ;;  %v2240_v58 = vmul.f32 0.6931472, %v2961_v16  ;;  %v4832_v6 = vld [vmem:[#allocation25_spill] sm:$0xff]  ;;  %v1804_v49 = vpop.xlane.xlu1 %1803  ;;  %v4835_v54 = vld [vmem:[#allocation7_spill] sm:$0xff] }
 0x52b   : > { %v2399_v38 = vsub.f32 0.0, %v2383_v47  ;;  %v2381_v46 = vadd.f32 %v2365_v45, %v2333_v11  ;;  %v2369_v42 = vmul.f32 %v4829_v15, %v2321_v18  ;;  %2421 = vadd.xlane.f32.xlu0 %v2420_v10  ;;  %v2304_v39 = vmul.f32 0.6931472, %v2963_v30  ;;  %v1807_v15 = vpop.xlane.xlu2 %1806 }
 0x52c   : > { %v2354_v1 = vsub.f32 1.0, %v3694_v36  ;;  %v4831_v8 = vsub.f32 1.0, %v4830_v33  ;;  %v2258_v43 = vmax.f32 %v2240_v58, -100.0  ;;  %v2275_v60 = vsub.f32 1.0, %v2211_v2 }
 0x52d   : > { %v2397_v37 = vsub.f32 0.0, %v2381_v46  ;;  %v2385_v63 = vadd.f32 %v2369_v42, %v2337_v29  ;;  %v2322_v50 = vmax.f32 %v2304_v39, -100.0  ;;  %v2435_v27 = vsel %vm1173_vm3, %v2399_v38, 0.0  ;;  %v4836_v38 = vld [vmem:[#allocation19_spill] sm:$0xff]  ;;  %v4837_v39 = vld [vmem:[#allocation21_spill] sm:$0xff] }
 0x52e   : > { %v2368_v14 = vmul.f32 %v4831_v8, %v2320_v41  ;;  %v2336_v48 = vmul.f32 %v4830_v33, %v2256_v20  ;;  %v2212_v44 = vmul.f32 %v4832_v6, %v2196_v61  ;;  %v2338_v4 = vmul.f32 %v3694_v36, %v2258_v43  ;;  %v1810_v61 = vpop.xlane.xlu0 %1809 }
 0x52f   : > { %v2401_v12 = vsub.f32 0.0, %v2385_v63  ;;  %v2429_v53 = vsel %vm1173_vm3, %v2397_v37, 0.0  ;;  %v2370_v17 = vmul.f32 %v2354_v1, %v2322_v50  ;;  %2966 = vlog2.f32 %v2275_v60 }
 0x530   : > { %v2384_v52 = vadd.f32 %v2368_v14, %v2336_v48  ;;  %2968 = vlog2.f32 %v2212_v44  ;;  %v2276_v23 = vsub.f32 1.0, %v2212_v44  ;;  %v2242_v22 = vmul.f32 0.6931472, %v2965_v51  ;;  %v4838_v14 = vld [vmem:[#allocation22_spill] sm:$0xff] }
 0x531   : > { %v2441_v35 = vsel %vm1173_vm3, %v2401_v12, 0.0  ;;  %v2386_v2 = vadd.f32 %v2370_v17, %v2338_v4  ;;  %v2355_v31 = vsub.f32 1.0, %v4833_v40  ;;  %v2356_v11 = vsub.f32 1.0, %v4834_v3  ;;  %v4840_v4 = vld [vmem:[#allocation23_spill] sm:$0xff] }
 0x532   : > { %2442 = vadd.xlane.f32.xlu1 %v2441_v35  ;;  %2436 = vadd.xlane.f32.xlu2 %v2435_v27  ;;  %2970 = vlog2.f32 %v2276_v23  ;;  %v2400_v28 = vsub.f32 0.0, %v2384_v52  ;;  %v2259_v25 = vmax.f32 %v2242_v22, -100.0  ;;  %v1813_v29 = vpop.xlane.xlu1 %1812  ;;  %vm2454_vm9 = vcmp.eq.s32.totalorder %v4835_v54, 1  ;;  %v4839_v27 = vld [vmem:[#allocation5_spill] sm:$0xff]  ;;  %v4841_v22 = vld [vmem:[#allocation20_spill] sm:$0xff] }
 0x533   : > { %2430 = vadd.xlane.f32.xlu0 %v2429_v53  ;;  %v2402_v62 = vsub.f32 0.0, %v2386_v2  ;;  %vm2453_vm10 = vcmp.eq.s32.totalorder %v4835_v54, 0  ;;  %v1816_v42 = vpop.xlane.xlu2 %1815 }
 0x534   : > { %v2438_v26 = vsel %vm1173_vm3, %v2400_v28, 0.0  ;;  %v2339_v0 = vmul.f32 %v4833_v40, %v2259_v25 }
 0x535   : > { %v2967_v32 = vpop.eup %2966  ;;  %v2444_v36 = vsel %vm1173_vm3, %v2402_v62, 0.0 }
 0x536   : > { %v2969_v56 = vpop.eup %2968  ;;  %v2306_v9 = vmul.f32 0.6931472, %v2967_v32  ;;  %v1819_v63 = vpop.xlane.xlu0 %1818 }
 0x537   : > { %v2244_v24 = vmul.f32 0.6931472, %v2969_v56 }
 0x538   : > { %v2971_v34 = vpop.eup %2970  ;;  %v2323_v21 = vmax.f32 %v2306_v9, -100.0 }
 0x539   : > { %v2260_v19 = vmax.f32 %v2244_v24, -100.0  ;;  %v2308_v59 = vmul.f32 0.6931472, %v2971_v34 }
 0x53a   : > { %2445 = vadd.xlane.f32.xlu2 %v2444_v36  ;;  %v2371_v13 = vmul.f32 %v2355_v31, %v2323_v21  ;;  %v4592_v20 = vpop.xlane.xlu1 %1821  ;;  %v4842_v36 = vld [vmem:[#allocation24_spill] sm:$0xff] }
 0x53b   : > { %2439 = vadd.xlane.f32.xlu0 %v2438_v26  ;;  %v2324_v5 = vmax.f32 %v2308_v59, -100.0  ;;  %v2340_v16 = vmul.f32 %v4834_v3, %v2260_v19  ;;  %v1825_v37 = vpop.xlane.xlu2 %1824 }
 0x53c   : > { %v2387_v55 = vadd.f32 %v2371_v13, %v2339_v0 }
 0x53d   : > { %v2372_v7 = vmul.f32 %v2356_v11, %v2324_v5 }
 0x53e   : > { %v2403_v47 = vsub.f32 0.0, %v2387_v55  ;;  %v1828_v48 = vpop.xlane.xlu0 %1827 }
 0x53f   : > { %v2388_v57 = vadd.f32 %v2372_v7, %v2340_v16 }
 0x540   : > { %v2447_v45 = vsel %vm1173_vm3, %v2403_v47, 0.0 }
 0x541   : > { %v2404_v18 = vsub.f32 0.0, %v2388_v57 }
 0x543   : > { %2448 = vadd.xlane.f32.xlu0 %v2447_v45  ;;  %v2450_v30 = vsel %vm1173_vm3, %v2404_v18, 0.0 }
 0x544   : > { %2451 = vadd.xlane.f32.xlu1 %v2450_v30 }
 0x55f   : > { %v2407_v51 = vpop.xlane.xlu1 %2406 }
 0x560   : > { %v2455_v10 = vsel %vm2454_vm9, %v2407_v51, 0.0 }
 0x561   : > { %v2471_v46 = vsel %vm2453_vm10, %v4836_v38, %v2455_v10 }
 0x562   : > { %2487 = vst [vmem:[%s4600_s12] sm:$0xff] %v2471_v46 }
 0x576   : > { %v2416_v41 = vpop.xlane.xlu1 %2415 }
 0x577   : > { %v2458_v58 = vsel %vm2454_vm9, %v2416_v41, 0.0 }
 0x578   : > { %v2474_v1 = vsel %vm2453_vm10, %v4837_v39, %v2458_v58 }
 0x579   : > { %2490 = vst [vmem:[%s4600_s12 + $0x18] sm:$0xff] %v2474_v1 }
 0x582   : > { %v2410_v33 = vpop.xlane.xlu2 %2409 }
 0x583   : > { %v2456_v8 = vsel %vm2454_vm9, %v2410_v33, 0.0 }
 0x584   : > { %v2472_v43 = vsel %vm2453_vm10, %v4838_v14, %v2456_v8 }
 0x585   : > { %2488 = vst [vmem:[%s4600_s12 + $0x8] sm:$0xff] %v2472_v43 }
 0x586   : > { %v2425_v50 = vpop.xlane.xlu1 %2424 }
 0x587   : > { %v2461_v60 = vsel %vm2454_vm9, %v2425_v50, 0.0 }
 0x588   : > { %v2477_v12 = vsel %vm2453_vm10, %v4839_v27, %v2461_v60 }
 0x589   : > { %2493 = vst [vmem:[%s4600_s12 + $0x30] sm:$0xff] %v2477_v12 }
 0x58d   : > { %v2419_v6 = vpop.xlane.xlu2 %2418 }
 0x58e   : > { %v2459_v44 = vsel %vm2454_vm9, %v2419_v6, 0.0 }
 0x58f   : > { %v2475_v17 = vsel %vm2453_vm10, %v4840_v4, %v2459_v44 }
 0x590   : > { %v2434_v53 = vpop.xlane.xlu1 %2433  ;;  %2491 = vst [vmem:[%s4600_s12 + $0x20] sm:$0xff] %v2475_v17 }
 0x591   : > { %v2464_v35 = vsel %vm2454_vm9, %v2434_v53, 0.0 }
 0x592   : > { %v2480_v52 = vsel %vm2453_vm10, %v1810_v61, %v2464_v35 }
 0x593   : > { %2496 = vst [vmem:[%s4600_s12 + $0x48] sm:$0xff] %v2480_v52  ;;  %v2413_v23 = vpop.xlane.xlu0 %2412 }
 0x594   : > { %v2457_v2 = vsel %vm2454_vm9, %v2413_v23, 0.0 }
 0x595   : > { %v2473_v62 = vsel %vm2453_vm10, %v4841_v22, %v2457_v2 }
 0x596   : > { %2489 = vst [vmem:[%s4600_s12 + $0x10] sm:$0xff] %v2473_v62 }
 0x59d   : > { %v2428_v28 = vpop.xlane.xlu2 %2427 }
 0x59e   : > { %v2422_v32 = vpop.xlane.xlu0 %2421  ;;  %v2462_v56 = vsel %vm2454_vm9, %v2428_v28, 0.0 }
 0x59f   : > { %v2460_v25 = vsel %vm2454_vm9, %v2422_v32, 0.0  ;;  %v2478_v9 = vsel %vm2453_vm10, %v1804_v49, %v2462_v56 }
 0x5a0   : > { %v2476_v24 = vsel %vm2453_vm10, %v4842_v36, %v2460_v25  ;;  %2494 = vst [vmem:[%s4600_s12 + $0x38] sm:$0xff] %v2478_v9 }
 0x5a1   : > { %2492 = vst [vmem:[%s4600_s12 + $0x28] sm:$0xff] %v2476_v24 }
 0x5a5   : > { %v2443_v34 = vpop.xlane.xlu1 %2442  ;;  %v2437_v40 = vpop.xlane.xlu2 %2436 }
 0x5a6   : > { %v2467_v31 = vsel %vm2454_vm9, %v2443_v34, 0.0  ;;  %v2431_v26 = vpop.xlane.xlu0 %2430  ;;  %v2465_v21 = vsel %vm2454_vm9, %v2437_v40, 0.0 }
 0x5a7   : > { %v2483_v19 = vsel %vm2453_vm10, %v1819_v63, %v2467_v31  ;;  %v2463_v59 = vsel %vm2454_vm9, %v2431_v26, 0.0  ;;  %v2481_v0 = vsel %vm2453_vm10, %v1813_v29, %v2465_v21 }
 0x5a8   : > { %2499 = vst [vmem:[%s4600_s12 + $0x60] sm:$0xff] %v2483_v19  ;;  %v2479_v13 = vsel %vm2453_vm10, %v1807_v15, %v2463_v59 }
 0x5a9   : > { %2497 = vst [vmem:[%s4600_s12 + $0x50] sm:$0xff] %v2481_v0 }
 0x5aa   : > { %2495 = vst [vmem:[%s4600_s12 + $0x40] sm:$0xff] %v2479_v13 }
 0x5ad   : > { %v2446_v3 = vpop.xlane.xlu2 %2445 }
 0x5ae   : > { %v2440_v11 = vpop.xlane.xlu0 %2439  ;;  %v2468_v5 = vsel %vm2454_vm9, %v2446_v3, 0.0 }
 0x5af   : > { %v2466_v55 = vsel %vm2454_vm9, %v2440_v11, 0.0  ;;  %v2484_v16 = vsel %vm2453_vm10, %v4592_v20, %v2468_v5 }
 0x5b0   : > { %v2482_v7 = vsel %vm2453_vm10, %v1816_v42, %v2466_v55  ;;  %2500 = vst [vmem:[%s4600_s12 + $0x68] sm:$0xff] %v2484_v16 }
 0x5b1   : > { %2498 = vst [vmem:[%s4600_s12 + $0x58] sm:$0xff] %v2482_v7 }
 0x5b6   : > { %v2449_v47 = vpop.xlane.xlu0 %2448 }
 0x5b7   : > { %v2469_v57 = vsel %vm2454_vm9, %v2449_v47, 0.0  ;;  %v2452_v45 = vpop.xlane.xlu1 %2451 }
 0x5b8   : > { %v2485_v18 = vsel %vm2453_vm10, %v1825_v37, %v2469_v57  ;;  %v2470_v30 = vsel %vm2454_vm9, %v2452_v45, 0.0 }
 0x5b9   : > { %2501 = vst [vmem:[%s4600_s12 + $0x70] sm:$0xff] %v2485_v18  ;;  %v2486_v49 = vsel %vm2453_vm10, %v1828_v48, %v2470_v30 }
 0x5ba   : > { %2502 = vst [vmem:[%s4600_s12 + $0x78] sm:$0xff] %v2486_v49 }
 0x5bb PF: > { %s15_s15 = sadd.s32 1, %s3012_s15  }
 0x5bc   : > { %p12_p7 = scmp.ge.s32.totalorder %s15_s15, 4  }
 0x5be   :  { %14 = sbr.rel (!%p12_p7) target bundleno = 1 (0x1), region = 77 }
 0x5c3   :  { %2525 = vsyncpa [#allocation3], 1 }
 0x5c4   :  { %2527 = vsyncpa [#allocation3 + $0x1], 1 }

</bundles_post_ra>
